<compile_context>
chip_gen: v7x
topology: tpu7x:2x2x1
jax: 0.10.0
libtpu: 0.0.40
codegen_flags: <defaults>
</compile_context>

<pallas_src>
import functools

import jax
import jax.numpy as jnp
from jax.experimental import pallas as pl
from jax.experimental.pallas import tpu as pltpu


def _round_up(x, m):
    return (x + m - 1) // m * m


def _vmem_limit_bytes(c, oc, n_taps, tt, halo_pad, isz):
    """VMEM budget from the actual (sublane/lane padded) buffer sizes."""
    p8 = lambda v: _round_up(v, 8)
    p128 = lambda v: _round_up(v, 128)
    est = (
        2 * p8(c) * tt * isz                     # main x tile (double-buffered)
        + 2 * p8(c) * halo_pad * isz             # halo x tile
        + 2 * n_taps * p8(oc) * p128(c) * isz    # tap-major weights
        + 2 * 8 * tt * 4                         # stats mask tile
        + 2 * p8(oc) * tt * 4                    # apply-pass output tile
        + 8 * p8(oc) * 128 * 4                   # stats accumulators / scale / shift
        + p8(c) * (tt + halo_pad) * isz          # slab scratch
    )
    try:
        cap = int(pltpu.get_tpu_info().vmem_capacity_bytes) * 3 // 4
    except Exception:
        cap = 48 << 20                           # safe on v5e/v6e (128 MiB) and v7x (64 MiB/TC)
    return int(min(max(2 * est, 8 << 20), cap))


def _conv_acc(slab_ref, w_ref, tap_offsets, tt):
    """Implicit GEMM: accumulate the KH*KW shifted (OC, C) @ (C, tt) matmuls in f32."""
    # TODO(synk): if the MXU becomes the limiter (v6e/v7x), stack the taps into one
    # [KH*KW*C, tt] VMEM slab and issue a single deeper contraction instead.
    acc = None
    for tap, off in enumerate(tap_offsets):
        y = jnp.dot(w_ref[tap], slab_ref[:, off:off + tt],
                    preferred_element_type=jnp.float32)
        acc = y if acc is None else acc + y
    return acc


def _stats_kernel(x_ref, xh_ref, w_ref, mask_ref, sum_ref, sq_ref, slab_ref, *,
                  tap_offsets, tt):
    """Per-image partial per-channel sum / sum-of-squares of the conv output."""
    t = pl.program_id(1)

    @pl.when(t == 0)
    def _():
        sum_ref[...] = jnp.zeros_like(sum_ref)
        sq_ref[...] = jnp.zeros_like(sq_ref)

    slab_ref[:, :tt] = x_ref[...]
    slab_ref[:, tt:] = xh_ref[...]

    y = _conv_acc(slab_ref, w_ref, tap_offsets, tt)          # [OC, tt] f32
    ym = y * mask_ref[...]                                   # zero out invalid columns
    sum_ref[...] += jnp.sum(ym, axis=1, keepdims=True)
    sq_ref[...] += jnp.sum(ym * y, axis=1, keepdims=True)
    # TODO(synk): E[y^2]-E[y]^2 in f32 is cancellation-prone for very large N*OH*OW;
    # switch to a shifted/compensated accumulation if that regime matters.


def _apply_kernel(x_ref, xh_ref, w_ref, scale_ref, shift_ref, o_ref, slab_ref, *,
                  tap_offsets, tt):
    """Conv (recomputed, small K) + fused affine BN + ReLU, lane-dense [OC, tt] store."""
    slab_ref[:, :tt] = x_ref[...]
    slab_ref[:, tt:] = xh_ref[...]
    y = _conv_acc(slab_ref, w_ref, tap_offsets, tt)          # [OC, tt] f32
    z = y * scale_ref[...] + shift_ref[...]
    o_ref[...] = jnp.maximum(z, 0.0).astype(o_ref.dtype)


def basic_conv2d(x, weight, gamma, beta, *, stride=1, padding=1, eps=1e-3,
                 tile_t=2048, compute_dtype=jnp.float32):
    """Forward of BasicConv2d. x: [N, C, H, W] NCHW. Returns [N, OC, OH, OW]."""
    n, c, h, w = x.shape
    oc, cin, kh, kw = weight.shape
    assert cin == c
    if isinstance(stride, (tuple, list)):
        assert stride[0] == stride[1]
        stride = int(stride[0])
    if isinstance(padding, (tuple, list)):
        assert padding[0] == padding[1]
        padding = int(padding[0])

    hp, wp = h + 2 * padding, w + 2 * padding
    oh = (hp - kh) // stride + 1
    ow = (wp - kw) // stride + 1
    oh_dense = hp - kh + 1                    # stride-1 output rows actually computed
    t_len = oh_dense * wp                     # dense flat output length per image

    halo = (kh - 1) * wp + (kw - 1)           # extra flat-input span needed per tile
    halo_pad = max(128, _round_up(halo, 128))
    tt = min(_round_up(tile_t, halo_pad), _round_up(t_len, halo_pad))
    assert tt % halo_pad == 0 and tt >= halo
    t_pad = _round_up(t_len, tt)
    n_t = t_pad // tt
    s_pad = t_pad + tt                        # flat-input length incl. room for the halo block

    # flat offset of tap (kh, kw) relative to the output position (stride-1 dense grid)
    tap_offsets = tuple(i * wp + j for i in range(kh) for j in range(kw))

    # --- host-side layout prep: a single ~1x pass over the input (no 9x im2col) ---
    x_pad = jnp.pad(x, ((0, 0), (0, 0), (padding, padding), (padding, padding)))
    x_flat = x_pad.reshape(n, c, hp * wp)
    x_flat = jnp.pad(x_flat, ((0, 0), (0, 0), (0, s_pad - hp * wp))).astype(compute_dtype)

    # weights, tap-major: [KH*KW, OC, C]
    w2 = jnp.transpose(weight.reshape(oc, c, kh * kw), (2, 0, 1)).astype(compute_dtype)

    # validity mask over the dense flat output positions (identical for every image)
    t_idx = jnp.arange(t_pad, dtype=jnp.int32)
    row, col = t_idx // wp, t_idx % wp
    valid = ((row % stride == 0) & (col % stride == 0) &
             (row // stride < oh) & (col // stride < ow))
    mask = valid.astype(jnp.float32).reshape(1, t_pad)

    isz = jnp.dtype(compute_dtype).itemsize
    vmem = _vmem_limit_bytes(c, oc, kh * kw, tt, halo_pad, isz)

    x_main_spec = pl.BlockSpec((None, c, tt), lambda b, i: (b, 0, i))
    x_halo_spec = pl.BlockSpec((None, c, halo_pad),
                               lambda b, i: (b, 0, (i + 1) * (tt // halo_pad)))
    w_spec = pl.BlockSpec((kh * kw, oc, c), lambda b, i: (0, 0, 0))
    stat_spec = pl.BlockSpec((None, oc, 1), lambda b, i: (b, 0, 0))
    chan_spec = pl.BlockSpec((oc, 1), lambda b, i: (0, 0))
    slab_scratch = pltpu.VMEM((c, tt + halo_pad), compute_dtype)

    # ---- Pass 1: per-image partial batch statistics of the conv output ----
    # Image axis is "parallel" (megacore split on v7x); reduction axis is innermost
    # "arbitrary" with per-image resident accumulators, combined in the wrapper.
    s_part, sq_part = pl.pallas_call(
        functools.partial(_stats_kernel, tap_offsets=tap_offsets, tt=tt),
        out_shape=(jax.ShapeDtypeStruct((n, oc, 1), jnp.float32),
                   jax.ShapeDtypeStruct((n, oc, 1), jnp.float32)),
        grid_spec=pltpu.PrefetchScalarGridSpec(
            num_scalar_prefetch=0,
            grid=(n, n_t),
            in_specs=[x_main_spec, x_halo_spec, w_spec,
                      pl.BlockSpec((1, tt), lambda b, i: (0, i))],
            out_specs=(stat_spec, stat_spec),
            scratch_shapes=[slab_scratch]),
        compiler_params=pltpu.CompilerParams(
            dimension_semantics=("parallel", "arbitrary"),
            vmem_limit_bytes=vmem),
    )(x_flat, x_flat, w2, mask)

    # BN constants, hoisted out of the per-tile kernel body.
    count = jnp.float32(n * oh * ow)
    s_tot = jnp.sum(s_part, axis=0).reshape(oc)
    sq_tot = jnp.sum(sq_part, axis=0).reshape(oc)
    mean = s_tot / count
    var = jnp.maximum(sq_tot / count - mean * mean, 0.0)      # biased var, clamped >= 0
    inv_std = jax.lax.rsqrt(var + jnp.float32(eps))
    scale = (gamma.astype(jnp.float32) * inv_std).reshape(oc, 1)
    shift = beta.astype(jnp.float32).reshape(oc, 1) - mean.reshape(oc, 1) * scale

    # ---- Pass 2: recompute conv (K is small) + fused affine BN + ReLU ----
    # TODO(synk): for large-K layers (C*KH*KW*isz > ~2*OC*4) store the raw conv output in
    # pass 1 and re-read it here instead of recomputing.
    out_dense = pl.pallas_call(
        functools.partial(_apply_kernel, tap_offsets=tap_offsets, tt=tt),
        out_shape=jax.ShapeDtypeStruct((n, oc, t_pad), jnp.float32),
        grid_spec=pltpu.PrefetchScalarGridSpec(
            num_scalar_prefetch=0,
            grid=(n, n_t),
            in_specs=[x_main_spec, x_halo_spec, w_spec, chan_spec, chan_spec],
            out_specs=pl.BlockSpec((None, oc, tt), lambda b, i: (b, 0, i)),
            scratch_shapes=[slab_scratch]),
        compiler_params=pltpu.CompilerParams(
            dimension_semantics=("parallel", "parallel"),   # megacore-shardable tiles
            vmem_limit_bytes=vmem),
    )(x_flat, x_flat, w2, scale, shift)

    # [N, OC, T] -> NCHW: drop W-padding columns (and stride-subsample if stride > 1).
    dense = out_dense[:, :, :t_len].reshape(n, oc, oh_dense, wp)
    out = dense[:, :, ::stride, ::stride][:, :, :oh, :ow]
    # TODO(synk): for stride > 1 this computes the dense stride-1 output and subsamples
    # (~stride^2 extra work); specialize the flat layout per stride if those layers matter.
    return out


def _reference(x, weight, gamma, beta, *, stride=1, padding=1, eps=1e-3):
    y = jax.lax.conv_general_dilated(
        x, weight, window_strides=(stride, stride),
        padding=((padding, padding), (padding, padding)),
        dimension_numbers=("NCHW", "OIHW", "NCHW"))
    mean = jnp.mean(y, axis=(0, 2, 3), keepdims=True)
    var = jnp.mean((y - mean) ** 2, axis=(0, 2, 3), keepdims=True)  # biased
    yhat = (y - mean) * jax.lax.rsqrt(var + eps)
    yhat = yhat * gamma.reshape(1, -1, 1, 1) + beta.reshape(1, -1, 1, 1)
    return jnp.maximum(yhat, 0.0)


if __name__ == "__main__":
    # BasicConv2d(in_channels=4, out_channels=8, kernel_size=3, padding=1)
    N, C, H, W = 2, 4, 16, 16
    OC, KH, KW = 8, 3, 3
    key = jax.random.PRNGKey(0)
    kx, kw_, kg, kb = jax.random.split(key, 4)
    x = jax.random.normal(kx, (N, C, H, W), dtype=jnp.float32)
    weight = 0.1 * jax.random.normal(kw_, (OC, C, KH, KW), dtype=jnp.float32)
    gamma = 1.0 + 0.1 * jax.random.normal(kg, (OC,), dtype=jnp.float32)
    beta = 0.1 * jax.random.normal(kb, (OC,), dtype=jnp.float32)

    fwd = jax.jit(functools.partial(basic_conv2d, stride=1, padding=1, eps=1e-3))
    out = jax.block_until_ready(fwd(x, weight, gamma, beta))

    ref = _reference(x, weight, gamma, beta, stride=1, padding=1, eps=1e-3)
    assert out.shape == (N, OC, H, W), out.shape
    err = float(jnp.max(jnp.abs(out - ref)))
    assert jnp.allclose(out, ref, rtol=1e-4, atol=1e-4), err
    print("KERNEL_OK")
</pallas_src>

<mosaic_0001>
module attributes {stable_mosaic.version = 11 : i64} {
  func.func @_stats_kernel(%arg0: i32, %arg1: i32, %arg2: memref<1x4x384xf32, #tpu.memory_space<vmem>>, %arg3: memref<1x4x128xf32, #tpu.memory_space<vmem>>, %arg4: memref<9x8x4xf32, #tpu.memory_space<vmem>>, %arg5: memref<1x384xf32, #tpu.memory_space<vmem>>, %arg6: memref<1x8x1xf32, #tpu.memory_space<vmem>>, %arg7: memref<1x8x1xf32, #tpu.memory_space<vmem>>, %arg8: memref<4x512xf32, #tpu.memory_space<vmem>>) attributes {dimension_semantics = [#tpu.dimension_semantics<parallel>, #tpu.dimension_semantics<arbitrary>], iteration_bounds = array<i64: 2, 1>, scalar_prefetch = 0 : i64, scratch_operands = 1 : i64, tpu.core_type = #tpu.core_type<tc>, window_params = [{transform_indices = @transform_0, window_bounds = array<i64: 1, 4, 384>}, {transform_indices = @transform_1, window_bounds = array<i64: 1, 4, 128>}, {pipeline_mode = #tpu.pipeline_mode<synchronous>, transform_indices = @transform_2, window_bounds = array<i64: 9, 8, 4>}, {transform_indices = @transform_3, window_bounds = array<i64: 1, 384>}, {transform_indices = @transform_4, window_bounds = array<i64: 1, 8, 1>}, {transform_indices = @transform_5, window_bounds = array<i64: 1, 8, 1>}]} {
    %c0_i32 = arith.constant 0 : i32
    %0 = arith.cmpi eq, %arg1, %c0_i32 : i32
    %1 = arith.extui %0 : i1 to i32
    %c0_i32_0 = arith.constant 0 : i32
    %2 = arith.cmpi ne, %1, %c0_i32_0 : i32
    scf.if %2 {
      %cst_64 = arith.constant 0.000000e+00 : f32
      %73 = vector.broadcast %cst_64 : f32 to vector<8x1xf32>
      %c0_65 = arith.constant 0 : index
      %c0_66 = arith.constant 0 : index
      %c0_67 = arith.constant 0 : index
      %74 = vector.load %arg6[%c0_65, %c0_66, %c0_67] : memref<1x8x1xf32, #tpu.memory_space<vmem>>, vector<1x8x1xf32>
      %75 = vector.shape_cast %74 : vector<1x8x1xf32> to vector<8x1xf32>
      %76 = vector.shape_cast %73 : vector<8x1xf32> to vector<1x8x1xf32>
      tpu.vector_store %arg6[%c0_65, %c0_66, %c0_67], %76 {strides = array<i32>} : memref<1x8x1xf32, #tpu.memory_space<vmem>>, vector<1x8x1xf32>,
      %cst_68 = arith.constant 0.000000e+00 : f32
      %77 = vector.broadcast %cst_68 : f32 to vector<8x1xf32>
      %c0_69 = arith.constant 0 : index
      %c0_70 = arith.constant 0 : index
      %c0_71 = arith.constant 0 : index
      %78 = vector.load %arg7[%c0_69, %c0_70, %c0_71] : memref<1x8x1xf32, #tpu.memory_space<vmem>>, vector<1x8x1xf32>
      %79 = vector.shape_cast %78 : vector<1x8x1xf32> to vector<8x1xf32>
      %80 = vector.shape_cast %77 : vector<8x1xf32> to vector<1x8x1xf32>
      tpu.vector_store %arg7[%c0_69, %c0_70, %c0_71], %80 {strides = array<i32>} : memref<1x8x1xf32, #tpu.memory_space<vmem>>, vector<1x8x1xf32>,
    } else {
    }
    %c0 = arith.constant 0 : index
    %c0_1 = arith.constant 0 : index
    %c0_2 = arith.constant 0 : index
    %3 = vector.load %arg2[%c0, %c0_1, %c0_2] : memref<1x4x384xf32, #tpu.memory_space<vmem>>, vector<1x4x384xf32>
    %4 = vector.shape_cast %3 : vector<1x4x384xf32> to vector<4x384xf32>
    %c0_3 = arith.constant 0 : index
    %c0_4 = arith.constant 0 : index
    %5 = vector.load %arg8[%c0_3, %c0_4] : memref<4x512xf32, #tpu.memory_space<vmem>>, vector<4x384xf32>
    tpu.vector_store %arg8[%c0_3, %c0_4], %4 {strides = array<i32>} : memref<4x512xf32, #tpu.memory_space<vmem>>, vector<4x384xf32>,
    %c0_5 = arith.constant 0 : index
    %c0_6 = arith.constant 0 : index
    %c0_7 = arith.constant 0 : index
    %6 = vector.load %arg3[%c0_5, %c0_6, %c0_7] : memref<1x4x128xf32, #tpu.memory_space<vmem>>, vector<1x4x128xf32>
    %7 = vector.shape_cast %6 : vector<1x4x128xf32> to vector<4x128xf32>
    %c0_8 = arith.constant 0 : index
    %c384 = arith.constant 384 : index
    %8 = vector.load %arg8[%c0_8, %c384] : memref<4x512xf32, #tpu.memory_space<vmem>>, vector<4x128xf32>
    tpu.vector_store %arg8[%c0_8, %c384], %7 {strides = array<i32>} : memref<4x512xf32, #tpu.memory_space<vmem>>, vector<4x128xf32>,
    %c0_9 = arith.constant 0 : index
    %c0_10 = arith.constant 0 : index
    %c0_11 = arith.constant 0 : index
    %9 = vector.load %arg4[%c0_9, %c0_10, %c0_11] : memref<9x8x4xf32, #tpu.memory_space<vmem>>, vector<1x8x4xf32>
    %10 = vector.shape_cast %9 : vector<1x8x4xf32> to vector<8x4xf32>
    %c0_12 = arith.constant 0 : index
    %c0_13 = arith.constant 0 : index
    %11 = vector.load %arg8[%c0_12, %c0_13] : memref<4x512xf32, #tpu.memory_space<vmem>>, vector<4x384xf32>
    %cst = arith.constant dense<0.000000e+00> : vector<8x384xf32>
    %12 = tpu.matmul %10, %11, %cst {dimension_numbers = #tpu.dot_dimension_numbers<[1], [0], [0], [1], [0, 0, 1, 1], [], []>} : vector<8x4xf32>, vector<4x384xf32>, vector<8x384xf32> -> vector<8x384xf32>
    %c1 = arith.constant 1 : index
    %c0_14 = arith.constant 0 : index
    %c0_15 = arith.constant 0 : index
    %13 = vector.load %arg4[%c1, %c0_14, %c0_15] : memref<9x8x4xf32, #tpu.memory_space<vmem>>, vector<1x8x4xf32>
    %14 = vector.shape_cast %13 : vector<1x8x4xf32> to vector<8x4xf32>
    %c0_16 = arith.constant 0 : index
    %c1_17 = arith.constant 1 : index
    %15 = vector.load %arg8[%c0_16, %c1_17] : memref<4x512xf32, #tpu.memory_space<vmem>>, vector<4x384xf32>
    %cst_18 = arith.constant dense<0.000000e+00> : vector<8x384xf32>
    %16 = tpu.matmul %14, %15, %cst_18 {dimension_numbers = #tpu.dot_dimension_numbers<[1], [0], [0], [1], [0, 0, 1, 1], [], []>} : vector<8x4xf32>, vector<4x384xf32>, vector<8x384xf32> -> vector<8x384xf32>
    %17 = arith.addf %12, %16 : vector<8x384xf32>
    %c2 = arith.constant 2 : index
    %c0_19 = arith.constant 0 : index
    %c0_20 = arith.constant 0 : index
    %18 = vector.load %arg4[%c2, %c0_19, %c0_20] : memref<9x8x4xf32, #tpu.memory_space<vmem>>, vector<1x8x4xf32>
    %19 = vector.shape_cast %18 : vector<1x8x4xf32> to vector<8x4xf32>
    %c0_21 = arith.constant 0 : index
    %c2_22 = arith.constant 2 : index
    %20 = vector.load %arg8[%c0_21, %c2_22] : memref<4x512xf32, #tpu.memory_space<vmem>>, vector<4x384xf32>
    %cst_23 = arith.constant dense<0.000000e+00> : vector<8x384xf32>
    %21 = tpu.matmul %19, %20, %cst_23 {dimension_numbers = #tpu.dot_dimension_numbers<[1], [0], [0], [1], [0, 0, 1, 1], [], []>} : vector<8x4xf32>, vector<4x384xf32>, vector<8x384xf32> -> vector<8x384xf32>
    %22 = arith.addf %17, %21 : vector<8x384xf32>
    %c3 = arith.constant 3 : index
    %c0_24 = arith.constant 0 : index
    %c0_25 = arith.constant 0 : index
    %23 = vector.load %arg4[%c3, %c0_24, %c0_25] : memref<9x8x4xf32, #tpu.memory_space<vmem>>, vector<1x8x4xf32>
    %24 = vector.shape_cast %23 : vector<1x8x4xf32> to vector<8x4xf32>
    %c0_26 = arith.constant 0 : index
    %c18 = arith.constant 18 : index
    %25 = vector.load %arg8[%c0_26, %c18] : memref<4x512xf32, #tpu.memory_space<vmem>>, vector<4x384xf32>
    %cst_27 = arith.constant dense<0.000000e+00> : vector<8x384xf32>
    %26 = tpu.matmul %24, %25, %cst_27 {dimension_numbers = #tpu.dot_dimension_numbers<[1], [0], [0], [1], [0, 0, 1, 1], [], []>} : vector<8x4xf32>, vector<4x384xf32>, vector<8x384xf32> -> vector<8x384xf32>
    %27 = arith.addf %22, %26 : vector<8x384xf32>
    %c4 = arith.constant 4 : index
    %c0_28 = arith.constant 0 : index
    %c0_29 = arith.constant 0 : index
    %28 = vector.load %arg4[%c4, %c0_28, %c0_29] : memref<9x8x4xf32, #tpu.memory_space<vmem>>, vector<1x8x4xf32>
    %29 = vector.shape_cast %28 : vector<1x8x4xf32> to vector<8x4xf32>
    %c0_30 = arith.constant 0 : index
    %c19 = arith.constant 19 : index
    %30 = vector.load %arg8[%c0_30, %c19] : memref<4x512xf32, #tpu.memory_space<vmem>>, vector<4x384xf32>
    %cst_31 = arith.constant dense<0.000000e+00> : vector<8x384xf32>
    %31 = tpu.matmul %29, %30, %cst_31 {dimension_numbers = #tpu.dot_dimension_numbers<[1], [0], [0], [1], [0, 0, 1, 1], [], []>} : vector<8x4xf32>, vector<4x384xf32>, vector<8x384xf32> -> vector<8x384xf32>
    %32 = arith.addf %27, %31 : vector<8x384xf32>
    %c5 = arith.constant 5 : index
    %c0_32 = arith.constant 0 : index
    %c0_33 = arith.constant 0 : index
    %33 = vector.load %arg4[%c5, %c0_32, %c0_33] : memref<9x8x4xf32, #tpu.memory_space<vmem>>, vector<1x8x4xf32>
    %34 = vector.shape_cast %33 : vector<1x8x4xf32> to vector<8x4xf32>
    %c0_34 = arith.constant 0 : index
    %c20 = arith.constant 20 : index
    %35 = vector.load %arg8[%c0_34, %c20] : memref<4x512xf32, #tpu.memory_space<vmem>>, vector<4x384xf32>
    %cst_35 = arith.constant dense<0.000000e+00> : vector<8x384xf32>
    %36 = tpu.matmul %34, %35, %cst_35 {dimension_numbers = #tpu.dot_dimension_numbers<[1], [0], [0], [1], [0, 0, 1, 1], [], []>} : vector<8x4xf32>, vector<4x384xf32>, vector<8x384xf32> -> vector<8x384xf32>
    %37 = arith.addf %32, %36 : vector<8x384xf32>
    %c6 = arith.constant 6 : index
    %c0_36 = arith.constant 0 : index
    %c0_37 = arith.constant 0 : index
    %38 = vector.load %arg4[%c6, %c0_36, %c0_37] : memref<9x8x4xf32, #tpu.memory_space<vmem>>, vector<1x8x4xf32>
    %39 = vector.shape_cast %38 : vector<1x8x4xf32> to vector<8x4xf32>
    %c0_38 = arith.constant 0 : index
    %c36 = arith.constant 36 : index
    %40 = vector.load %arg8[%c0_38, %c36] : memref<4x512xf32, #tpu.memory_space<vmem>>, vector<4x384xf32>
    %cst_39 = arith.constant dense<0.000000e+00> : vector<8x384xf32>
    %41 = tpu.matmul %39, %40, %cst_39 {dimension_numbers = #tpu.dot_dimension_numbers<[1], [0], [0], [1], [0, 0, 1, 1], [], []>} : vector<8x4xf32>, vector<4x384xf32>, vector<8x384xf32> -> vector<8x384xf32>
    %42 = arith.addf %37, %41 : vector<8x384xf32>
    %c7 = arith.constant 7 : index
    %c0_40 = arith.constant 0 : index
    %c0_41 = arith.constant 0 : index
    %43 = vector.load %arg4[%c7, %c0_40, %c0_41] : memref<9x8x4xf32, #tpu.memory_space<vmem>>, vector<1x8x4xf32>
    %44 = vector.shape_cast %43 : vector<1x8x4xf32> to vector<8x4xf32>
    %c0_42 = arith.constant 0 : index
    %c37 = arith.constant 37 : index
    %45 = vector.load %arg8[%c0_42, %c37] : memref<4x512xf32, #tpu.memory_space<vmem>>, vector<4x384xf32>
    %cst_43 = arith.constant dense<0.000000e+00> : vector<8x384xf32>
    %46 = tpu.matmul %44, %45, %cst_43 {dimension_numbers = #tpu.dot_dimension_numbers<[1], [0], [0], [1], [0, 0, 1, 1], [], []>} : vector<8x4xf32>, vector<4x384xf32>, vector<8x384xf32> -> vector<8x384xf32>
    %47 = arith.addf %42, %46 : vector<8x384xf32>
    %c8 = arith.constant 8 : index
    %c0_44 = arith.constant 0 : index
    %c0_45 = arith.constant 0 : index
    %48 = vector.load %arg4[%c8, %c0_44, %c0_45] : memref<9x8x4xf32, #tpu.memory_space<vmem>>, vector<1x8x4xf32>
    %49 = vector.shape_cast %48 : vector<1x8x4xf32> to vector<8x4xf32>
    %c0_46 = arith.constant 0 : index
    %c38 = arith.constant 38 : index
    %50 = vector.load %arg8[%c0_46, %c38] : memref<4x512xf32, #tpu.memory_space<vmem>>, vector<4x384xf32>
    %cst_47 = arith.constant dense<0.000000e+00> : vector<8x384xf32>
    %51 = tpu.matmul %49, %50, %cst_47 {dimension_numbers = #tpu.dot_dimension_numbers<[1], [0], [0], [1], [0, 0, 1, 1], [], []>} : vector<8x4xf32>, vector<4x384xf32>, vector<8x384xf32> -> vector<8x384xf32>
    %52 = arith.addf %47, %51 : vector<8x384xf32>
    %c0_48 = arith.constant 0 : index
    %c0_49 = arith.constant 0 : index
    %53 = vector.load %arg5[%c0_48, %c0_49] : memref<1x384xf32, #tpu.memory_space<vmem>>, vector<1x384xf32>
    %54 = vector.broadcast %53 : vector<1x384xf32> to vector<8x384xf32>
    %55 = arith.mulf %52, %54 : vector<8x384xf32>
    %c0_50 = arith.constant 0 : index
    %c0_51 = arith.constant 0 : index
    %c0_52 = arith.constant 0 : index
    %56 = vector.load %arg6[%c0_50, %c0_51, %c0_52] : memref<1x8x1xf32, #tpu.memory_space<vmem>>, vector<1x8x1xf32>
    %57 = vector.shape_cast %56 : vector<1x8x1xf32> to vector<8x1xf32>
    %cst_53 = arith.constant dense<0.000000e+00> : vector<8xf32>
    %58 = vector.multi_reduction <add>, %55, %cst_53 [1] : vector<8x384xf32> to vector<8xf32>
    %59 = vector.shape_cast %58 : vector<8xf32> to vector<8x1xf32>
    %60 = arith.addf %57, %59 : vector<8x1xf32>
    %c0_54 = arith.constant 0 : index
    %c0_55 = arith.constant 0 : index
    %c0_56 = arith.constant 0 : index
    %61 = vector.load %arg6[%c0_54, %c0_55, %c0_56] : memref<1x8x1xf32, #tpu.memory_space<vmem>>, vector<1x8x1xf32>
    %62 = vector.shape_cast %61 : vector<1x8x1xf32> to vector<8x1xf32>
    %63 = vector.shape_cast %60 : vector<8x1xf32> to vector<1x8x1xf32>
    tpu.vector_store %arg6[%c0_54, %c0_55, %c0_56], %63 {strides = array<i32>} : memref<1x8x1xf32, #tpu.memory_space<vmem>>, vector<1x8x1xf32>,
    %c0_57 = arith.constant 0 : index
    %c0_58 = arith.constant 0 : index
    %c0_59 = arith.constant 0 : index
    %64 = vector.load %arg7[%c0_57, %c0_58, %c0_59] : memref<1x8x1xf32, #tpu.memory_space<vmem>>, vector<1x8x1xf32>
    %65 = vector.shape_cast %64 : vector<1x8x1xf32> to vector<8x1xf32>
    %66 = arith.mulf %55, %52 : vector<8x384xf32>
    %cst_60 = arith.constant dense<0.000000e+00> : vector<8xf32>
    %67 = vector.multi_reduction <add>, %66, %cst_60 [1] : vector<8x384xf32> to vector<8xf32>
    %68 = vector.shape_cast %67 : vector<8xf32> to vector<8x1xf32>
    %69 = arith.addf %65, %68 : vector<8x1xf32>
    %c0_61 = arith.constant 0 : index
    %c0_62 = arith.constant 0 : index
    %c0_63 = arith.constant 0 : index
    %70 = vector.load %arg7[%c0_61, %c0_62, %c0_63] : memref<1x8x1xf32, #tpu.memory_space<vmem>>, vector<1x8x1xf32>
    %71 = vector.shape_cast %70 : vector<1x8x1xf32> to vector<8x1xf32>
    %72 = vector.shape_cast %69 : vector<8x1xf32> to vector<1x8x1xf32>
    tpu.vector_store %arg7[%c0_61, %c0_62, %c0_63], %72 {strides = array<i32>} : memref<1x8x1xf32, #tpu.memory_space<vmem>>, vector<1x8x1xf32>,
    return
  }
  func.func @transform_0(%arg0: i32, %arg1: i32) -> (i32, i32, i32) {
    %c0_i32 = arith.constant 0 : i32
    %c0_i32_0 = arith.constant 0 : i32
    return %arg0, %c0_i32, %arg1 : i32, i32, i32
  }
  func.func @transform_1(%arg0: i32, %arg1: i32) -> (i32, i32, i32) {
    %c1_i32 = arith.constant 1 : i32
    %0 = arith.addi %arg1, %c1_i32 : i32
    %c3_i32 = arith.constant 3 : i32
    %1 = arith.muli %0, %c3_i32 : i32
    %c0_i32 = arith.constant 0 : i32
    %c0_i32_0 = arith.constant 0 : i32
    return %arg0, %c0_i32, %1 : i32, i32, i32
  }
  func.func @transform_2(%arg0: i32, %arg1: i32) -> (i32, i32, i32) {
    %c0_i32 = arith.constant 0 : i32
    %c0_i32_0 = arith.constant 0 : i32
    %c0_i32_1 = arith.constant 0 : i32
    %c0_i32_2 = arith.constant 0 : i32
    return %c0_i32, %c0_i32_0, %c0_i32_1 : i32, i32, i32
  }
  func.func @transform_3(%arg0: i32, %arg1: i32) -> (i32, i32) {
    %c0_i32 = arith.constant 0 : i32
    %c0_i32_0 = arith.constant 0 : i32
    return %c0_i32, %arg1 : i32, i32
  }
  func.func @transform_4(%arg0: i32, %arg1: i32) -> (i32, i32, i32) {
    %c0_i32 = arith.constant 0 : i32
    %c0_i32_0 = arith.constant 0 : i32
    %c0_i32_1 = arith.constant 0 : i32
    return %arg0, %c0_i32, %c0_i32_0 : i32, i32, i32
  }
  func.func @transform_5(%arg0: i32, %arg1: i32) -> (i32, i32, i32) {
    %c0_i32 = arith.constant 0 : i32
    %c0_i32_0 = arith.constant 0 : i32
    %c0_i32_1 = arith.constant 0 : i32
    return %arg0, %c0_i32, %c0_i32_0 : i32, i32, i32
  }
}

module attributes {stable_mosaic.version = 11 : i64} {
  func.func @_apply_kernel(%arg0: i32, %arg1: i32, %arg2: memref<1x4x384xf32, #tpu.memory_space<vmem>>, %arg3: memref<1x4x128xf32, #tpu.memory_space<vmem>>, %arg4: memref<9x8x4xf32, #tpu.memory_space<vmem>>, %arg5: memref<8x1xf32, #tpu.memory_space<vmem>>, %arg6: memref<8x1xf32, #tpu.memory_space<vmem>>, %arg7: memref<1x8x384xf32, #tpu.memory_space<vmem>>, %arg8: memref<4x512xf32, #tpu.memory_space<vmem>>) attributes {dimension_semantics = [#tpu.dimension_semantics<parallel>, #tpu.dimension_semantics<parallel>], iteration_bounds = array<i64: 2, 1>, scalar_prefetch = 0 : i64, scratch_operands = 1 : i64, tpu.core_type = #tpu.core_type<tc>, window_params = [{transform_indices = @transform_0, window_bounds = array<i64: 1, 4, 384>}, {transform_indices = @transform_1, window_bounds = array<i64: 1, 4, 128>}, {pipeline_mode = #tpu.pipeline_mode<synchronous>, transform_indices = @transform_2, window_bounds = array<i64: 9, 8, 4>}, {pipeline_mode = #tpu.pipeline_mode<synchronous>, transform_indices = @transform_3, window_bounds = array<i64: 8, 1>}, {pipeline_mode = #tpu.pipeline_mode<synchronous>, transform_indices = @transform_4, window_bounds = array<i64: 8, 1>}, {transform_indices = @transform_5, window_bounds = array<i64: 1, 8, 384>}]} {
    %c0 = arith.constant 0 : index
    %c0_0 = arith.constant 0 : index
    %c0_1 = arith.constant 0 : index
    %0 = vector.load %arg2[%c0, %c0_0, %c0_1] : memref<1x4x384xf32, #tpu.memory_space<vmem>>, vector<1x4x384xf32>
    %1 = vector.shape_cast %0 : vector<1x4x384xf32> to vector<4x384xf32>
    %c0_2 = arith.constant 0 : index
    %c0_3 = arith.constant 0 : index
    %2 = vector.load %arg8[%c0_2, %c0_3] : memref<4x512xf32, #tpu.memory_space<vmem>>, vector<4x384xf32>
    tpu.vector_store %arg8[%c0_2, %c0_3], %1 {strides = array<i32>} : memref<4x512xf32, #tpu.memory_space<vmem>>, vector<4x384xf32>,
    %c0_4 = arith.constant 0 : index
    %c0_5 = arith.constant 0 : index
    %c0_6 = arith.constant 0 : index
    %3 = vector.load %arg3[%c0_4, %c0_5, %c0_6] : memref<1x4x128xf32, #tpu.memory_space<vmem>>, vector<1x4x128xf32>
    %4 = vector.shape_cast %3 : vector<1x4x128xf32> to vector<4x128xf32>
    %c0_7 = arith.constant 0 : index
    %c384 = arith.constant 384 : index
    %5 = vector.load %arg8[%c0_7, %c384] : memref<4x512xf32, #tpu.memory_space<vmem>>, vector<4x128xf32>
    tpu.vector_store %arg8[%c0_7, %c384], %4 {strides = array<i32>} : memref<4x512xf32, #tpu.memory_space<vmem>>, vector<4x128xf32>,
    %c0_8 = arith.constant 0 : index
    %c0_9 = arith.constant 0 : index
    %c0_10 = arith.constant 0 : index
    %6 = vector.load %arg4[%c0_8, %c0_9, %c0_10] : memref<9x8x4xf32, #tpu.memory_space<vmem>>, vector<1x8x4xf32>
    %7 = vector.shape_cast %6 : vector<1x8x4xf32> to vector<8x4xf32>
    %c0_11 = arith.constant 0 : index
    %c0_12 = arith.constant 0 : index
    %8 = vector.load %arg8[%c0_11, %c0_12] : memref<4x512xf32, #tpu.memory_space<vmem>>, vector<4x384xf32>
    %cst = arith.constant dense<0.000000e+00> : vector<8x384xf32>
    %9 = tpu.matmul %7, %8, %cst {dimension_numbers = #tpu.dot_dimension_numbers<[1], [0], [0], [1], [0, 0, 1, 1], [], []>} : vector<8x4xf32>, vector<4x384xf32>, vector<8x384xf32> -> vector<8x384xf32>
    %c1 = arith.constant 1 : index
    %c0_13 = arith.constant 0 : index
    %c0_14 = arith.constant 0 : index
    %10 = vector.load %arg4[%c1, %c0_13, %c0_14] : memref<9x8x4xf32, #tpu.memory_space<vmem>>, vector<1x8x4xf32>
    %11 = vector.shape_cast %10 : vector<1x8x4xf32> to vector<8x4xf32>
    %c0_15 = arith.constant 0 : index
    %c1_16 = arith.constant 1 : index
    %12 = vector.load %arg8[%c0_15, %c1_16] : memref<4x512xf32, #tpu.memory_space<vmem>>, vector<4x384xf32>
    %cst_17 = arith.constant dense<0.000000e+00> : vector<8x384xf32>
    %13 = tpu.matmul %11, %12, %cst_17 {dimension_numbers = #tpu.dot_dimension_numbers<[1], [0], [0], [1], [0, 0, 1, 1], [], []>} : vector<8x4xf32>, vector<4x384xf32>, vector<8x384xf32> -> vector<8x384xf32>
    %14 = arith.addf %9, %13 : vector<8x384xf32>
    %c2 = arith.constant 2 : index
    %c0_18 = arith.constant 0 : index
    %c0_19 = arith.constant 0 : index
    %15 = vector.load %arg4[%c2, %c0_18, %c0_19] : memref<9x8x4xf32, #tpu.memory_space<vmem>>, vector<1x8x4xf32>
    %16 = vector.shape_cast %15 : vector<1x8x4xf32> to vector<8x4xf32>
    %c0_20 = arith.constant 0 : index
    %c2_21 = arith.constant 2 : index
    %17 = vector.load %arg8[%c0_20, %c2_21] : memref<4x512xf32, #tpu.memory_space<vmem>>, vector<4x384xf32>
    %cst_22 = arith.constant dense<0.000000e+00> : vector<8x384xf32>
    %18 = tpu.matmul %16, %17, %cst_22 {dimension_numbers = #tpu.dot_dimension_numbers<[1], [0], [0], [1], [0, 0, 1, 1], [], []>} : vector<8x4xf32>, vector<4x384xf32>, vector<8x384xf32> -> vector<8x384xf32>
    %19 = arith.addf %14, %18 : vector<8x384xf32>
    %c3 = arith.constant 3 : index
    %c0_23 = arith.constant 0 : index
    %c0_24 = arith.constant 0 : index
    %20 = vector.load %arg4[%c3, %c0_23, %c0_24] : memref<9x8x4xf32, #tpu.memory_space<vmem>>, vector<1x8x4xf32>
    %21 = vector.shape_cast %20 : vector<1x8x4xf32> to vector<8x4xf32>
    %c0_25 = arith.constant 0 : index
    %c18 = arith.constant 18 : index
    %22 = vector.load %arg8[%c0_25, %c18] : memref<4x512xf32, #tpu.memory_space<vmem>>, vector<4x384xf32>
    %cst_26 = arith.constant dense<0.000000e+00> : vector<8x384xf32>
    %23 = tpu.matmul %21, %22, %cst_26 {dimension_numbers = #tpu.dot_dimension_numbers<[1], [0], [0], [1], [0, 0, 1, 1], [], []>} : vector<8x4xf32>, vector<4x384xf32>, vector<8x384xf32> -> vector<8x384xf32>
    %24 = arith.addf %19, %23 : vector<8x384xf32>
    %c4 = arith.constant 4 : index
    %c0_27 = arith.constant 0 : index
    %c0_28 = arith.constant 0 : index
    %25 = vector.load %arg4[%c4, %c0_27, %c0_28] : memref<9x8x4xf32, #tpu.memory_space<vmem>>, vector<1x8x4xf32>
    %26 = vector.shape_cast %25 : vector<1x8x4xf32> to vector<8x4xf32>
    %c0_29 = arith.constant 0 : index
    %c19 = arith.constant 19 : index
    %27 = vector.load %arg8[%c0_29, %c19] : memref<4x512xf32, #tpu.memory_space<vmem>>, vector<4x384xf32>
    %cst_30 = arith.constant dense<0.000000e+00> : vector<8x384xf32>
    %28 = tpu.matmul %26, %27, %cst_30 {dimension_numbers = #tpu.dot_dimension_numbers<[1], [0], [0], [1], [0, 0, 1, 1], [], []>} : vector<8x4xf32>, vector<4x384xf32>, vector<8x384xf32> -> vector<8x384xf32>
    %29 = arith.addf %24, %28 : vector<8x384xf32>
    %c5 = arith.constant 5 : index
    %c0_31 = arith.constant 0 : index
    %c0_32 = arith.constant 0 : index
    %30 = vector.load %arg4[%c5, %c0_31, %c0_32] : memref<9x8x4xf32, #tpu.memory_space<vmem>>, vector<1x8x4xf32>
    %31 = vector.shape_cast %30 : vector<1x8x4xf32> to vector<8x4xf32>
    %c0_33 = arith.constant 0 : index
    %c20 = arith.constant 20 : index
    %32 = vector.load %arg8[%c0_33, %c20] : memref<4x512xf32, #tpu.memory_space<vmem>>, vector<4x384xf32>
    %cst_34 = arith.constant dense<0.000000e+00> : vector<8x384xf32>
    %33 = tpu.matmul %31, %32, %cst_34 {dimension_numbers = #tpu.dot_dimension_numbers<[1], [0], [0], [1], [0, 0, 1, 1], [], []>} : vector<8x4xf32>, vector<4x384xf32>, vector<8x384xf32> -> vector<8x384xf32>
    %34 = arith.addf %29, %33 : vector<8x384xf32>
    %c6 = arith.constant 6 : index
    %c0_35 = arith.constant 0 : index
    %c0_36 = arith.constant 0 : index
    %35 = vector.load %arg4[%c6, %c0_35, %c0_36] : memref<9x8x4xf32, #tpu.memory_space<vmem>>, vector<1x8x4xf32>
    %36 = vector.shape_cast %35 : vector<1x8x4xf32> to vector<8x4xf32>
    %c0_37 = arith.constant 0 : index
    %c36 = arith.constant 36 : index
    %37 = vector.load %arg8[%c0_37, %c36] : memref<4x512xf32, #tpu.memory_space<vmem>>, vector<4x384xf32>
    %cst_38 = arith.constant dense<0.000000e+00> : vector<8x384xf32>
    %38 = tpu.matmul %36, %37, %cst_38 {dimension_numbers = #tpu.dot_dimension_numbers<[1], [0], [0], [1], [0, 0, 1, 1], [], []>} : vector<8x4xf32>, vector<4x384xf32>, vector<8x384xf32> -> vector<8x384xf32>
    %39 = arith.addf %34, %38 : vector<8x384xf32>
    %c7 = arith.constant 7 : index
    %c0_39 = arith.constant 0 : index
    %c0_40 = arith.constant 0 : index
    %40 = vector.load %arg4[%c7, %c0_39, %c0_40] : memref<9x8x4xf32, #tpu.memory_space<vmem>>, vector<1x8x4xf32>
    %41 = vector.shape_cast %40 : vector<1x8x4xf32> to vector<8x4xf32>
    %c0_41 = arith.constant 0 : index
    %c37 = arith.constant 37 : index
    %42 = vector.load %arg8[%c0_41, %c37] : memref<4x512xf32, #tpu.memory_space<vmem>>, vector<4x384xf32>
    %cst_42 = arith.constant dense<0.000000e+00> : vector<8x384xf32>
    %43 = tpu.matmul %41, %42, %cst_42 {dimension_numbers = #tpu.dot_dimension_numbers<[1], [0], [0], [1], [0, 0, 1, 1], [], []>} : vector<8x4xf32>, vector<4x384xf32>, vector<8x384xf32> -> vector<8x384xf32>
    %44 = arith.addf %39, %43 : vector<8x384xf32>
    %c8 = arith.constant 8 : index
    %c0_43 = arith.constant 0 : index
    %c0_44 = arith.constant 0 : index
    %45 = vector.load %arg4[%c8, %c0_43, %c0_44] : memref<9x8x4xf32, #tpu.memory_space<vmem>>, vector<1x8x4xf32>
    %46 = vector.shape_cast %45 : vector<1x8x4xf32> to vector<8x4xf32>
    %c0_45 = arith.constant 0 : index
    %c38 = arith.constant 38 : index
    %47 = vector.load %arg8[%c0_45, %c38] : memref<4x512xf32, #tpu.memory_space<vmem>>, vector<4x384xf32>
    %cst_46 = arith.constant dense<0.000000e+00> : vector<8x384xf32>
    %48 = tpu.matmul %46, %47, %cst_46 {dimension_numbers = #tpu.dot_dimension_numbers<[1], [0], [0], [1], [0, 0, 1, 1], [], []>} : vector<8x4xf32>, vector<4x384xf32>, vector<8x384xf32> -> vector<8x384xf32>
    %49 = arith.addf %44, %48 : vector<8x384xf32>
    %c0_47 = arith.constant 0 : index
    %c0_48 = arith.constant 0 : index
    %50 = vector.load %arg5[%c0_47, %c0_48] : memref<8x1xf32, #tpu.memory_space<vmem>>, vector<8x1xf32>
    %51 = vector.broadcast %50 : vector<8x1xf32> to vector<8x384xf32>
    %52 = arith.mulf %49, %51 : vector<8x384xf32>
    %c0_49 = arith.constant 0 : index
    %c0_50 = arith.constant 0 : index
    %53 = vector.load %arg6[%c0_49, %c0_50] : memref<8x1xf32, #tpu.memory_space<vmem>>, vector<8x1xf32>
    %54 = vector.broadcast %53 : vector<8x1xf32> to vector<8x384xf32>
    %55 = arith.addf %52, %54 : vector<8x384xf32>
    %cst_51 = arith.constant 0.000000e+00 : f32
    %56 = vector.broadcast %cst_51 : f32 to vector<8x384xf32>
    %57 = arith.maximumf %55, %56 : vector<8x384xf32>
    %c0_52 = arith.constant 0 : index
    %c0_53 = arith.constant 0 : index
    %c0_54 = arith.constant 0 : index
    %58 = vector.load %arg7[%c0_52, %c0_53, %c0_54] : memref<1x8x384xf32, #tpu.memory_space<vmem>>, vector<1x8x384xf32>
    %59 = vector.shape_cast %58 : vector<1x8x384xf32> to vector<8x384xf32>
    %60 = vector.shape_cast %57 : vector<8x384xf32> to vector<1x8x384xf32>
    tpu.vector_store %arg7[%c0_52, %c0_53, %c0_54], %60 {strides = array<i32>} : memref<1x8x384xf32, #tpu.memory_space<vmem>>, vector<1x8x384xf32>,
    return
  }
  func.func @transform_0(%arg0: i32, %arg1: i32) -> (i32, i32, i32) {
    %c0_i32 = arith.constant 0 : i32
    %c0_i32_0 = arith.constant 0 : i32
    return %arg0, %c0_i32, %arg1 : i32, i32, i32
  }
  func.func @transform_1(%arg0: i32, %arg1: i32) -> (i32, i32, i32) {
    %c1_i32 = arith.constant 1 : i32
    %0 = arith.addi %arg1, %c1_i32 : i32
    %c3_i32 = arith.constant 3 : i32
    %1 = arith.muli %0, %c3_i32 : i32
    %c0_i32 = arith.constant 0 : i32
    %c0_i32_0 = arith.constant 0 : i32
    return %arg0, %c0_i32, %1 : i32, i32, i32
  }
  func.func @transform_2(%arg0: i32, %arg1: i32) -> (i32, i32, i32) {
    %c0_i32 = arith.constant 0 : i32
    %c0_i32_0 = arith.constant 0 : i32
    %c0_i32_1 = arith.constant 0 : i32
    %c0_i32_2 = arith.constant 0 : i32
    return %c0_i32, %c0_i32_0, %c0_i32_1 : i32, i32, i32
  }
  func.func @transform_3(%arg0: i32, %arg1: i32) -> (i32, i32) {
    %c0_i32 = arith.constant 0 : i32
    %c0_i32_0 = arith.constant 0 : i32
    %c0_i32_1 = arith.constant 0 : i32
    return %c0_i32, %c0_i32_0 : i32, i32
  }
  func.func @transform_4(%arg0: i32, %arg1: i32) -> (i32, i32) {
    %c0_i32 = arith.constant 0 : i32
    %c0_i32_0 = arith.constant 0 : i32
    %c0_i32_1 = arith.constant 0 : i32
    return %c0_i32, %c0_i32_0 : i32, i32
  }
  func.func @transform_5(%arg0: i32, %arg1: i32) -> (i32, i32, i32) {
    %c0_i32 = arith.constant 0 : i32
    %c0_i32_0 = arith.constant 0 : i32
    return %arg0, %c0_i32, %arg1 : i32, i32, i32
  }
}

</mosaic_0001>

<bundles_post_ra>
// kernel: basic_conv2d.3
= control target key start
LH: loop header
LB: loop body
LE: loop exit
PB: predicated region body
PF: predicated region fallthrough
CT: control target
= control target key end

     0   :  { %s2250_s18 = smov 0   ;;  %s2252_s19 = smov 0   ;;  %s2450_s0 = inlined_call_operand.vmem [shape: f32[2,4,768], index: 0, kind: input, shape index: {}, may-alias: {0,1}]   ;;  %s2451_s1 = inlined_call_operand.vmem [shape: f32[2,4,768], index: 1, kind: input, shape index: {}, may-alias: {0,1}]   ;;  %s2452_s2 = inlined_call_operand.vmem [shape: f32[9,8,4], index: 2, kind: input, shape index: {}]   ;;  %s2453_s3 = inlined_call_operand.vmem [shape: f32[8,1], index: 3, kind: input, shape index: {}]   ;;  %s2454_s4 = inlined_call_operand.vmem [shape: f32[8,1], index: 4, kind: input, shape index: {}]   ;;  %s2455_s5 = inlined_call_operand.vmem [shape: f32[2,8,384], index: 5, kind: output, shape index: {}]  }
   0x1   :  { %s2254_s20 = smov 0  }
   0x2 LB: > { %s27_s21 = sadd.s32 1, %s2203_s19  ;;  %p1987_p0 = scmp.ge.s32.totalorder %s2207_s20, 1  ;;  %s2207_s20 = sphi %s2254_s20, %s15_s20   ;;  %s2203_s19 = sphi %s2252_s19, %s2457_s19   ;;  %s2199_s18 = sphi %s2250_s18, %s2456_s18  }
   0x3   : > { %p29_p1 = scmp.ge.s32.totalorder %s27_s21, 2  ;;  %p231_p2 = scmp.lt.s32.totalorder %s2207_s20, 3 }
   0x5   : > { %s2459_s21 = smov (%p29_p1, %s27_s21), 0  ;;  %p232_p3 = pnand %p1987_p0, %p231_p2 }
   0x6   : > { %p278_p4 = scmp.lt.s32.totalorder (!%p232_p3), %s2199_s18, 1  ;;  %v2209_v0 = vmov (!%p232_p3), 0.0   ;;  %vm2210_vm0 = vmmov (!%p232_p3), 0   ;;  %s2211_s30 = smov (!%p232_p3), 127   ;;  %v2219_v7 = vmov (!%p232_p3), 0   ;;  %v1854_v8 = vld [vmem:[%s2453_s3] sm:$0xff] (!%p232_p3) }
   0x7   : > { %235 = sbr.rel (%p232_p3) target bundleno = 430 (0x1ae), region = 40  ;;  %2066 = vmatprep.subr.mxu1 (!%p232_p3), %v2209_v0  ;;  %413 = vmatprep.mubr.f32.mxu0 (!%p232_p3), %v2209_v0  ;;  %s2212_s6 = smov (!%p232_p3), 126   ;;  %v1863_v9 = vld [vmem:[%s2454_s4] sm:$0xff] (!%p232_p3)  ;;  %vm334_vm1 = vcmask (!%p232_p3), 1039360   ;;  %vm342_vm2 = vcmask (!%p232_p3), 1043456   ;;  %v1991_v14 = vld [vmem:[%s2452_s2 + $0x8] sm:$0xff] (!%p232_p3) }
   0x8   : > { %2068 = vmatprep.mubr.msk.f32.mxu1 (!%p232_p3), %vm2210_vm0, %v2209_v0  ;;  %s2213_s7 = smov (!%p232_p3), 110   ;;  %s2214_s8 = smov (!%p232_p3), 109   ;;  %2182 = vset.pattern.permute.xlu1 (!%p232_p3), %v2219_v7  ;;  %vm338_vm3 = vcmask (!%p232_p3), 31744   ;;  %vm659_vm4 = vcmask (!%p232_p3), 1031168   ;;  %v315_v23 = vld [vmem:[%s2452_s2] sm:$0xff] (!%p232_p3)  ;;  %vm832_vm5 = vcmask (!%p232_p3), 900096  }
   0x9   : > { %s2215_s9 = smov (!%p232_p3), 108   ;;  %s2216_s10 = smov (!%p232_p3), 92   ;;  %2181 = vset.pattern.permute.xlu0 (!%p232_p3), %v2219_v7  ;;  %v2002_v31 = vld [vmem:[%s2452_s2 + $0x10] sm:$0xff] (!%p232_p3)  ;;  %vm1005_vm6 = vcmask (!%p232_p3), 891904   ;;  %v2008_v39 = vld [vmem:[%s2452_s2 + $0x18] sm:$0xff] (!%p232_p3)  ;;  %vm1178_vm7 = vcmask (!%p232_p3), 883712  }
   0xa   : > { %s2217_s11 = smov (!%p232_p3), 91   ;;  %s2218_s12 = smov (!%p232_p3), 90   ;;  %v2014_v47 = vld [vmem:[%s2452_s2 + $0x20] sm:$0xff] (!%p232_p3)  ;;  %vm1351_vm8 = vcmask (!%p232_p3), 752640   ;;  %v2020_v55 = vld [vmem:[%s2452_s2 + $0x28] sm:$0xff] (!%p232_p3)  ;;  %vm1524_vm9 = vcmask (!%p232_p3), 744448  }
   0xb   : > { %v2026_v63 = vld [vmem:[%s2452_s2 + $0x30] sm:$0xff] (!%p232_p3)  ;;  %vm1697_vm10 = vcmask (!%p232_p3), 736256  }
   0xe   : > { %s2461_s18 = smov (!%p278_p4, %s2199_s18), 1 }
   0xf   : > { %s2268_s22 = smul.u32 24, %s2461_s18 }
  0x11   : > { %s285_s25 = scalar_lea.vmem %s2450_s0, %s2268_s22  ;;  %s2047_s26 = sadd.s32 12, %s2268_s22 }
  0x12   : > { %v2277_v1 = vld [vmem:[%s285_s25] sm:$0xff]  ;;  %v310_v2 = vld [vmem:[%s285_s25 + $0x8] sm:$0xf]  ;;  %s296_s29 = scalar_lea.vmem %s2451_s1, %s2047_s26  ;;  %s307_s16 = scalar_lea.vmem %s2455_s5, %s2268_s22 }
  0x13   : > { %312 = vst [vmem:[#allocation2 + $0x8] sm:$0xf] %v310_v2  ;;  %326 = vrot.lane.b32.xlu1 %v2277_v1, %s2211_s30  ;;  %v2287_v3 = vcombine.high %v2277_v1, %v2277_v1  ;;  %v313_v4 = vld [vmem:[%s296_s29] sm:$0xf] }
  0x14   : > { %314 = vst [vmem:[#allocation2 + $0xc] sm:$0xf] %v313_v4 }
  0x15   : > { %328 = vrot.lane.b32.xlu0 %v2287_v3, %s2211_s30 }
  0x1a   : > { %v317_v19 = vld [vmem:[#allocation2 + $0x8] sm:$0xf] }
  0x1b   : > { %v321_v5 = vld [vmem:[#allocation2 + $0x8] sm:$0xff] }
  0x1c   : > { %v325_v6 = vcombine.high %v321_v5, %v321_v5  ;;  %330 = vrot.lane.b32.xlu0 %v321_v5, %s2211_s30 }
  0x1e   : > { %332 = vrot.lane.b32.xlu1 %v325_v6, %s2211_s30 }
  0x20   : > { %653 = vrot.lane.b32.xlu0 %v2287_v3, %s2212_s6 }
  0x22   : > { %655 = vrot.lane.b32.xlu1 %v321_v5, %s2212_s6 }
  0x24   : > { %651 = vrot.lane.b32.xlu0 %v2277_v1, %s2212_s6 }
  0x26   : > { %657 = vrot.lane.b32.xlu1 %v325_v6, %s2212_s6 }
  0x28   : > { %826 = vrot.lane.b32.xlu0 %v2287_v3, %s2213_s7 }
  0x2a   : > { %828 = vrot.lane.b32.xlu1 %v321_v5, %s2213_s7 }
  0x2c   : > { %824 = vrot.lane.b32.xlu0 %v2277_v1, %s2213_s7 }
  0x2e   : > { %830 = vrot.lane.b32.xlu1 %v325_v6, %s2213_s7 }
  0x30   : > { %999 = vrot.lane.b32.xlu0 %v2287_v3, %s2214_s8 }
  0x32   : > { %1001 = vrot.lane.b32.xlu1 %v321_v5, %s2214_s8 }
  0x34   : > { %997 = vrot.lane.b32.xlu0 %v2277_v1, %s2214_s8 }
  0x36   : > { %1003 = vrot.lane.b32.xlu1 %v325_v6, %s2214_s8 }
  0x38   : > { %1172 = vrot.lane.b32.xlu0 %v2287_v3, %s2215_s9 }
  0x3a   : > { %1174 = vrot.lane.b32.xlu1 %v321_v5, %s2215_s9 }
  0x3c   : > { %1170 = vrot.lane.b32.xlu0 %v2277_v1, %s2215_s9 }
  0x3e   : > { %1176 = vrot.lane.b32.xlu1 %v325_v6, %s2215_s9 }
  0x40   : > { %1345 = vrot.lane.b32.xlu0 %v2287_v3, %s2216_s10 }
  0x42   : > { %1347 = vrot.lane.b32.xlu1 %v321_v5, %s2216_s10 }
  0x44   : > { %1343 = vrot.lane.b32.xlu0 %v2277_v1, %s2216_s10 }
  0x46   : > { %1349 = vrot.lane.b32.xlu1 %v325_v6, %s2216_s10 }
  0x48   : > { %1518 = vrot.lane.b32.xlu0 %v2287_v3, %s2217_s11 }
  0x4a   : > { %1520 = vrot.lane.b32.xlu1 %v321_v5, %s2217_s11 }
  0x4c   : > { %1516 = vrot.lane.b32.xlu0 %v2277_v1, %s2217_s11 }
  0x4e   : > { %1522 = vrot.lane.b32.xlu1 %v325_v6, %s2217_s11 }
  0x50   : > { %1691 = vrot.lane.b32.xlu0 %v2287_v3, %s2218_s12 }
  0x52   : > { %1693 = vrot.lane.b32.xlu1 %v321_v5, %s2218_s12 }
  0x54   : > { %1689 = vrot.lane.b32.xlu0 %v2277_v1, %s2218_s12 }
  0x56   : > { %1695 = vrot.lane.b32.xlu1 %v325_v6, %s2218_s12 }
  0x58   : > { %1857 = vperm.xlu0 %2181, %v1854_v8   ;;  %v2032_v8 = vld [vmem:[%s2452_s2 + $0x38] sm:$0xff] }
  0x5a   : > { %1866 = vperm.xlu1 %2182, %v1863_v9  }
  0x85   : > { %v327_v11 = vpop.permute.xlu1 %326 }
  0x87   : > { %v329_v10 = vpop.permute.xlu0 %328 }
  0x88   : > { %v335_v16 = vsel %vm334_vm1, %v327_v11, %v329_v10 }
  0x8e   : > { %v331_v12 = vpop.permute.xlu0 %330 }
  0x8f   : > { %v336_v13 = vsel %vm334_vm1, %v329_v10, %v331_v12 }
  0x90   : > { %v333_v15 = vpop.permute.xlu1 %332  ;;  %1992 = vmatprep.subr.msk.mxu0 %vm342_vm2, %v336_v13 }
  0x91   : > { %v337_v17 = vsel %vm334_vm1, %v331_v12, %v333_v15  ;;  %1993 = vmatpush1.msk.msra.mxu0 %vm342_vm2, %v335_v16  ;;  %v2038_v12 = vld [vmem:[%s2452_s2 + $0x40] sm:$0xff] }
  0x92   : > { %2067 = vmatpush3.msk.msra.mxu1 %vm342_vm2, %v337_v17  ;;  %1994 = vmatmul.mubr.msk.f32.vlgmr.msra.gmra.mrb[0].mxu0 %vm338_vm3, %v1991_v14  ;;  %v654_v18 = vpop.permute.xlu0 %653 }
  0x93   : > { %2069 = vmatmul.mubr.msk.f32.vlgmr.msra.gmra.mrb[0].mxu1 %vm338_vm3, %v1991_v14  ;;  %1997 = vmatprep.subr.msk.mxu0 %vm342_vm2, %v2287_v3 }
  0x94   : > { %v656_v20 = vpop.permute.xlu1 %655  ;;  %1998 = vmatpush1.msk.msra.mxu0 %vm342_vm2, %v2277_v1  ;;  %2071 = vmatprep.subr.mxu1 %v2209_v0 }
  0x95   : > { %v661_v21 = vsel %vm659_vm4, %v654_v18, %v656_v20  ;;  %2072 = vmatpush3.msk.msra.mxu1 %vm342_vm2, %v317_v19  ;;  %2073 = vmatprep.mubr.msk.f32.mxu1 %vm2210_vm0, %v2209_v0 }
  0x96   : > { %v652_v22 = vpop.permute.xlu0 %651  ;;  %2003 = vmatprep.subr.msk.mxu0 %vm342_vm2, %v661_v21  ;;  %2076 = vmatprep.subr.mxu1 %v2209_v0 }
  0x97   : > { %566 = vmatprep.mubr.f32.mxu0 %v2209_v0  ;;  %v660_v25 = vsel %vm659_vm4, %v652_v22, %v654_v18 }
  0x98   : > { %v658_v24 = vpop.permute.xlu1 %657 }
  0x99   : > { %v662_v26 = vsel %vm659_vm4, %v656_v20, %v658_v24 }
  0x9a   : > { %v827_v27 = vpop.permute.xlu0 %826  ;;  %1999 = vmatmul.mubr.msk.f32.vlgmr.msra.gmra.mrb[0].mxu0 %vm338_vm3, %v315_v23 }
  0x9b   : > { %2074 = vmatmul.mubr.msk.f32.vlgmr.msra.gmra.mrb[0].mxu1 %vm338_vm3, %v315_v23  ;;  %2004 = vmatpush1.msk.msra.mxu0 %vm342_vm2, %v660_v25 }
  0x9c   : > { %2077 = vmatpush3.msk.msra.mxu1 %vm342_vm2, %v662_v26  ;;  %v829_v28 = vpop.permute.xlu1 %828  ;;  %2078 = vmatprep.mubr.msk.f32.mxu1 %vm2210_vm0, %v2209_v0 }
  0x9d   : > { %v834_v29 = vsel %vm832_vm5, %v827_v27, %v829_v28  ;;  %2081 = vmatprep.subr.mxu1 %v2209_v0  ;;  %736 = vmatprep.mubr.f32.mxu0 %v2209_v0 }
  0x9e   : > { %v825_v30 = vpop.permute.xlu0 %824  ;;  %2009 = vmatprep.subr.msk.mxu0 %vm342_vm2, %v834_v29 }
  0x9f   : > { %v833_v33 = vsel %vm832_vm5, %v825_v30, %v827_v27 }
  0xa0   : > { %v831_v32 = vpop.permute.xlu1 %830 }
  0xa1   : > { %v835_v34 = vsel %vm832_vm5, %v829_v28, %v831_v32 }
  0xa2   : > { %v1000_v35 = vpop.permute.xlu0 %999  ;;  %2005 = vmatmul.mubr.msk.f32.vlgmr.msra.gmra.mrb[0].mxu0 %vm338_vm3, %v2002_v31 }
  0xa3   : > { %2079 = vmatmul.mubr.msk.f32.vlgmr.msra.gmra.mrb[0].mxu1 %vm338_vm3, %v2002_v31  ;;  %2010 = vmatpush1.msk.msra.mxu0 %vm342_vm2, %v833_v33 }
  0xa4   : > { %2082 = vmatpush3.msk.msra.mxu1 %vm342_vm2, %v835_v34  ;;  %v1002_v36 = vpop.permute.xlu1 %1001  ;;  %2083 = vmatprep.mubr.msk.f32.mxu1 %vm2210_vm0, %v2209_v0 }
  0xa5   : > { %v1007_v37 = vsel %vm1005_vm6, %v1000_v35, %v1002_v36  ;;  %2086 = vmatprep.subr.mxu1 %v2209_v0  ;;  %909 = vmatprep.mubr.f32.mxu0 %v2209_v0 }
  0xa6   : > { %v998_v38 = vpop.permute.xlu0 %997  ;;  %2015 = vmatprep.subr.msk.mxu0 %vm342_vm2, %v1007_v37 }
  0xa7   : > { %v1006_v41 = vsel %vm1005_vm6, %v998_v38, %v1000_v35 }
  0xa8   : > { %v1004_v40 = vpop.permute.xlu1 %1003 }
  0xa9   : > { %v1008_v42 = vsel %vm1005_vm6, %v1002_v36, %v1004_v40 }
  0xaa   : > { %v1173_v43 = vpop.permute.xlu0 %1172  ;;  %2011 = vmatmul.mubr.msk.f32.vlgmr.msra.gmra.mrb[0].mxu0 %vm338_vm3, %v2008_v39 }
  0xab   : > { %2084 = vmatmul.mubr.msk.f32.vlgmr.msra.gmra.mrb[0].mxu1 %vm338_vm3, %v2008_v39  ;;  %2016 = vmatpush1.msk.msra.mxu0 %vm342_vm2, %v1006_v41 }
  0xac   : > { %2087 = vmatpush3.msk.msra.mxu1 %vm342_vm2, %v1008_v42  ;;  %v1175_v44 = vpop.permute.xlu1 %1174  ;;  %2088 = vmatprep.mubr.msk.f32.mxu1 %vm2210_vm0, %v2209_v0 }
  0xad   : > { %v1180_v45 = vsel %vm1178_vm7, %v1173_v43, %v1175_v44  ;;  %2091 = vmatprep.subr.mxu1 %v2209_v0  ;;  %1082 = vmatprep.mubr.f32.mxu0 %v2209_v0 }
  0xae   : > { %v1171_v46 = vpop.permute.xlu0 %1170  ;;  %2021 = vmatprep.subr.msk.mxu0 %vm342_vm2, %v1180_v45 }
  0xaf   : > { %v1179_v49 = vsel %vm1178_vm7, %v1171_v46, %v1173_v43 }
  0xb0   : > { %v1177_v48 = vpop.permute.xlu1 %1176 }
  0xb1   : > { %v1181_v50 = vsel %vm1178_vm7, %v1175_v44, %v1177_v48 }
  0xb2   : > { %v1346_v51 = vpop.permute.xlu0 %1345  ;;  %2017 = vmatmul.mubr.msk.f32.vlgmr.msra.gmra.mrb[0].mxu0 %vm338_vm3, %v2014_v47 }
  0xb3   : > { %2089 = vmatmul.mubr.msk.f32.vlgmr.msra.gmra.mrb[0].mxu1 %vm338_vm3, %v2014_v47  ;;  %2022 = vmatpush1.msk.msra.mxu0 %vm342_vm2, %v1179_v49 }
  0xb4   : > { %2092 = vmatpush3.msk.msra.mxu1 %vm342_vm2, %v1181_v50  ;;  %v1348_v52 = vpop.permute.xlu1 %1347  ;;  %2093 = vmatprep.mubr.msk.f32.mxu1 %vm2210_vm0, %v2209_v0 }
  0xb5   : > { %v1353_v53 = vsel %vm1351_vm8, %v1346_v51, %v1348_v52  ;;  %2096 = vmatprep.subr.mxu1 %v2209_v0  ;;  %1255 = vmatprep.mubr.f32.mxu0 %v2209_v0 }
  0xb6   : > { %v1344_v54 = vpop.permute.xlu0 %1343  ;;  %2027 = vmatprep.subr.msk.mxu0 %vm342_vm2, %v1353_v53 }
  0xb7   : > { %v1352_v57 = vsel %vm1351_vm8, %v1344_v54, %v1346_v51 }
  0xb8   : > { %v1350_v56 = vpop.permute.xlu1 %1349 }
  0xb9   : > { %v1354_v58 = vsel %vm1351_vm8, %v1348_v52, %v1350_v56 }
  0xba   : > { %v1519_v59 = vpop.permute.xlu0 %1518  ;;  %2023 = vmatmul.mubr.msk.f32.vlgmr.msra.gmra.mrb[0].mxu0 %vm338_vm3, %v2020_v55 }
  0xbb   : > { %2094 = vmatmul.mubr.msk.f32.vlgmr.msra.gmra.mrb[0].mxu1 %vm338_vm3, %v2020_v55  ;;  %2028 = vmatpush1.msk.msra.mxu0 %vm342_vm2, %v1352_v57 }
  0xbc   : > { %2097 = vmatpush3.msk.msra.mxu1 %vm342_vm2, %v1354_v58  ;;  %v1521_v60 = vpop.permute.xlu1 %1520  ;;  %2098 = vmatprep.mubr.msk.f32.mxu1 %vm2210_vm0, %v2209_v0 }
  0xbd   : > { %v1526_v61 = vsel %vm1524_vm9, %v1519_v59, %v1521_v60  ;;  %2101 = vmatprep.subr.mxu1 %v2209_v0  ;;  %1428 = vmatprep.mubr.f32.mxu0 %v2209_v0 }
  0xbe   : > { %v1517_v62 = vpop.permute.xlu0 %1516  ;;  %2033 = vmatprep.subr.msk.mxu0 %vm342_vm2, %v1526_v61 }
  0xbf   : > { %v1525_v2 = vsel %vm1524_vm9, %v1517_v62, %v1519_v59 }
  0xc0   : > { %v1523_v1 = vpop.permute.xlu1 %1522 }
  0xc1   : > { %v1527_v3 = vsel %vm1524_vm9, %v1521_v60, %v1523_v1 }
  0xc2   : > { %v1692_v4 = vpop.permute.xlu0 %1691  ;;  %2029 = vmatmul.mubr.msk.f32.vlgmr.msra.gmra.mrb[0].mxu0 %vm338_vm3, %v2026_v63 }
  0xc3   : > { %2099 = vmatmul.mubr.msk.f32.vlgmr.msra.gmra.mrb[0].mxu1 %vm338_vm3, %v2026_v63  ;;  %2034 = vmatpush1.msk.msra.mxu0 %vm342_vm2, %v1525_v2 }
  0xc4   : > { %2102 = vmatpush3.msk.msra.mxu1 %vm342_vm2, %v1527_v3  ;;  %v1694_v5 = vpop.permute.xlu1 %1693  ;;  %2103 = vmatprep.mubr.msk.f32.mxu1 %vm2210_vm0, %v2209_v0 }
  0xc5   : > { %v1699_v6 = vsel %vm1697_vm10, %v1692_v4, %v1694_v5  ;;  %2106 = vmatprep.subr.mxu1 %v2209_v0  ;;  %1601 = vmatprep.mubr.f32.mxu0 %v2209_v0 }
  0xc6   : > { %v1690_v7 = vpop.permute.xlu0 %1689  ;;  %2039 = vmatprep.subr.msk.mxu0 %vm342_vm2, %v1699_v6 }
  0xc7   : > { %v1698_v10 = vsel %vm1697_vm10, %v1690_v7, %v1692_v4 }
  0xc8   : > { %v1696_v9 = vpop.permute.xlu1 %1695 }
  0xc9   : > { %v1700_v11 = vsel %vm1697_vm10, %v1694_v5, %v1696_v9 }
  0xca   : > { %2035 = vmatmul.mubr.msk.f32.vlgmr.msra.gmra.mrb[0].mxu0 %vm338_vm3, %v2032_v8 }
  0xcb   : > { %2104 = vmatmul.mubr.msk.f32.vlgmr.msra.gmra.mrb[0].mxu1 %vm338_vm3, %v2032_v8  ;;  %2040 = vmatpush1.msk.msra.mxu0 %vm342_vm2, %v1698_v10 }
  0xcc   : > { %2107 = vmatpush3.msk.msra.mxu1 %vm342_vm2, %v1700_v11  ;;  %2108 = vmatprep.mubr.msk.f32.mxu1 %vm2210_vm0, %v2209_v0 }
  0xcd   : > { %1774 = vmatprep.mubr.f32.mxu0 %v2209_v0 }
  0xd2   : > { %2041 = vmatmul.mubr.msk.f32.vlgmr.msra.gmra.mrb[0].mxu0 %vm338_vm3, %v2038_v12 }
  0xd3   : > { %2109 = vmatmul.mubr.msk.f32.vlgmr.msra.gmra.mrb[0].mxu1 %vm338_vm3, %v2038_v12 }
  0xd7   : > { %v1858_v13 = vpop.permute.xlu0 %1857 }
  0xd9   : > { %v1867_v15 = vpop.permute.xlu1 %1866 }
 0x1a5   : > { %v1776_v14 = vpop.f32.mrb[0].mxu0 }
 0x1a6   : > { %v1847_v16 = vpop.f32.mrb[0].mxu1  ;;  %v1860_v17 = vmul.f32 %v1858_v13, %v1776_v14  ;;  %v1778_v18 = vpop.f32.mrb[1].mxu0 }
 0x1a7   : > { %v1862_v19 = vmul.f32 %v1858_v13, %v1847_v16  ;;  %v2110_v20 = vpop.f32.mrb[1].mxu1  ;;  %v1861_v21 = vmul.f32 %v1858_v13, %v1778_v18 }
 0x1a8   : > { %v1869_v22 = vadd.f32 %v1867_v15, %v1860_v17 }
 0x1a9   : > { %v1871_v0 = vadd.f32 %v1867_v15, %v1862_v19  ;;  %v1870_v23 = vadd.f32 %v1867_v15, %v1861_v21 }
 0x1aa   : > { %v1872_v24 = vmax.f32 %v1869_v22, 0.0 }
 0x1ab   : > { %v1874_v25 = vmax.f32 %v1871_v0, 0.0  ;;  %v1873_v26 = vmax.f32 %v1870_v23, 0.0 }
 0x1ac   : > { %1875 = vst [vmem:[%s307_s16] sm:$0xff] %v1872_v24 }
 0x1ad   : > { %1877 = vst [vmem:[%s307_s16 + $0x10] sm:$0xff] %v1874_v25  ;;  %1876 = vst [vmem:[%s307_s16 + $0x8] sm:$0xff] %v1873_v26 }
 0x1ae PF: > { %s15_s20 = sadd.s32 1, %s2207_s20   ;;  %s2456_s18 = smov %s2203_s19 }
 0x1af   : > { %p12_p5 = scmp.ge.s32.totalorder %s15_s20, 4   ;;  %s2457_s19 = smov %s2459_s21 }
 0x1b1   :  { %14 = sbr.rel (!%p12_p5) target bundleno = 2 (0x2), region = 81 }

// kernel: basic_conv2d.2
= control target key start
LH: loop header
LB: loop body
LE: loop exit
PB: predicated region body
PF: predicated region fallthrough
CT: control target
= control target key end

     0   :  { %s2310_s18 = smov 0   ;;  %s2312_s19 = smov 0   ;;  %s2495_s0 = inlined_call_operand.vmem [shape: f32[2,4,768], index: 0, kind: input, shape index: {}, may-alias: {0,1}]   ;;  %s2496_s1 = inlined_call_operand.vmem [shape: f32[2,4,768], index: 1, kind: input, shape index: {}, may-alias: {0,1}]   ;;  %s2497_s2 = inlined_call_operand.vmem [shape: f32[9,8,4], index: 2, kind: input, shape index: {}]   ;;  %s2498_s3 = inlined_call_operand.vmem [shape: f32[1,384], index: 3, kind: input, shape index: {}]   ;;  %s2499_s4 = inlined_call_operand.vmem [shape: f32[2,8,1], index: 4, kind: output, shape index: {0}]   ;;  %s2500_s5 = inlined_call_operand.vmem [shape: f32[2,8,1], index: 5, kind: output, shape index: {1}]  }
   0x1   :  { %s2314_s20 = smov 0  }
   0x2 LB: > { %s28_s21 = sadd.s32 1, %s2264_s19  ;;  %p2050_p0 = scmp.ge.s32.totalorder %s2268_s20, 1  ;;  %s2268_s20 = sphi %s2314_s20, %s16_s20   ;;  %s2264_s19 = sphi %s2312_s19, %s2502_s19   ;;  %s2260_s18 = sphi %s2310_s18, %s2501_s18  }
   0x3   : > { %p30_p1 = scmp.ge.s32.totalorder %s28_s21, 2  ;;  %p242_p2 = scmp.lt.s32.totalorder %s2268_s20, 3 }
   0x5   : > { %s2504_s21 = smov (%p30_p1, %s28_s21), 0  ;;  %p243_p3 = pnand %p2050_p0, %p242_p2 }
   0x6   : > { %p292_p4 = scmp.lt.s32.totalorder (!%p243_p3), %s2260_s18, 1  ;;  %v2270_v0 = vmov (!%p243_p3), 0.0   ;;  %vm2271_vm0 = vmmov (!%p243_p3), 0   ;;  %s2272_s30 = smov (!%p243_p3), 127   ;;  %vm358_vm1 = vcmask (!%p243_p3), 1039360   ;;  %vm366_vm2 = vcmask (!%p243_p3), 1043456  }
   0x7   : > { %246 = sbr.rel (%p243_p3) target bundleno = 576 (0x240), region = 36  ;;  %2130 = vmatprep.subr.mxu1 (!%p243_p3), %v2270_v0  ;;  %437 = vmatprep.mubr.f32.mxu0 (!%p243_p3), %v2270_v0  ;;  %s2273_s6 = smov (!%p243_p3), 126   ;;  %v2055_v11 = vld [vmem:[%s2497_s2 + $0x8] sm:$0xff] (!%p243_p3)  ;;  %vm362_vm3 = vcmask (!%p243_p3), 31744   ;;  %vm683_vm4 = vcmask (!%p243_p3), 1031168   ;;  %v339_v20 = vld [vmem:[%s2497_s2] sm:$0xff] (!%p243_p3) }
   0x8   : > { %2132 = vmatprep.mubr.msk.f32.mxu1 (!%p243_p3), %vm2271_vm0, %v2270_v0  ;;  %s2274_s7 = smov (!%p243_p3), 110   ;;  %s2275_s8 = smov (!%p243_p3), 109   ;;  %vm856_vm5 = vcmask (!%p243_p3), 900096   ;;  %v2066_v28 = vld [vmem:[%s2497_s2 + $0x10] sm:$0xff] (!%p243_p3)  ;;  %vm1029_vm6 = vcmask (!%p243_p3), 891904   ;;  %v2072_v36 = vld [vmem:[%s2497_s2 + $0x18] sm:$0xff] (!%p243_p3) }
   0x9   : > { %s2276_s9 = smov (!%p243_p3), 108   ;;  %s2277_s10 = smov (!%p243_p3), 92   ;;  %vm1202_vm7 = vcmask (!%p243_p3), 883712   ;;  %v2078_v44 = vld [vmem:[%s2497_s2 + $0x20] sm:$0xff] (!%p243_p3)  ;;  %vm1375_vm8 = vcmask (!%p243_p3), 752640   ;;  %v2084_v52 = vld [vmem:[%s2497_s2 + $0x28] sm:$0xff] (!%p243_p3) }
   0xa   : > { %s2278_s11 = smov (!%p243_p3), 91   ;;  %s2279_s12 = smov (!%p243_p3), 90   ;;  %vm1548_vm9 = vcmask (!%p243_p3), 744448   ;;  %v2090_v60 = vld [vmem:[%s2497_s2 + $0x30] sm:$0xff] (!%p243_p3)  ;;  %vm1721_vm10 = vcmask (!%p243_p3), 736256   ;;  %vm330_vm11 = vcmask (!%p243_p3), 7168  }
   0xe   : > { %s2506_s18 = smov (!%p292_p4, %s2260_s18), 1 }
   0xf   : > { %s2207_s22 = smul.u32 24, %s2506_s18 }
  0x11   : > { %s299_s25 = scalar_lea.vmem %s2495_s0, %s2207_s22  ;;  %s2111_s26 = sadd.s32 12, %s2207_s22 }
  0x12   : > { %v2336_v1 = vld [vmem:[%s299_s25] sm:$0xff]  ;;  %v334_v2 = vld [vmem:[%s299_s25 + $0x8] sm:$0xf]  ;;  %s310_s29 = scalar_lea.vmem %s2496_s1, %s2111_s26 }
  0x13   : > { %336 = vst [vmem:[#allocation2 + $0x8] sm:$0xf] %v334_v2  ;;  %350 = vrot.lane.b32.xlu1 %v2336_v1, %s2272_s30  ;;  %v348_v3 = vcombine.high %v2336_v1, %v2336_v1  ;;  %v337_v4 = vld [vmem:[%s310_s29] sm:$0xf] }
  0x14   : > { %338 = vst [vmem:[#allocation2 + $0xc] sm:$0xf] %v337_v4 }
  0x15   : > { %352 = vrot.lane.b32.xlu0 %v348_v3, %s2272_s30 }
  0x1a   : > { %v341_v16 = vld [vmem:[#allocation2 + $0x8] sm:$0xf] }
  0x1b   : > { %v345_v5 = vld [vmem:[#allocation2 + $0x8] sm:$0xff] }
  0x1c   : > { %v349_v6 = vcombine.high %v345_v5, %v345_v5  ;;  %354 = vrot.lane.b32.xlu0 %v345_v5, %s2272_s30 }
  0x1e   : > { %356 = vrot.lane.b32.xlu1 %v349_v6, %s2272_s30 }
  0x20   : > { %677 = vrot.lane.b32.xlu0 %v348_v3, %s2273_s6 }
  0x22   : > { %679 = vrot.lane.b32.xlu1 %v345_v5, %s2273_s6 }
  0x24   : > { %675 = vrot.lane.b32.xlu0 %v2336_v1, %s2273_s6 }
  0x26   : > { %681 = vrot.lane.b32.xlu1 %v349_v6, %s2273_s6 }
  0x28   : > { %850 = vrot.lane.b32.xlu0 %v348_v3, %s2274_s7 }
  0x2a   : > { %852 = vrot.lane.b32.xlu1 %v345_v5, %s2274_s7 }
  0x2c   : > { %848 = vrot.lane.b32.xlu0 %v2336_v1, %s2274_s7 }
  0x2e   : > { %854 = vrot.lane.b32.xlu1 %v349_v6, %s2274_s7 }
  0x30   : > { %1023 = vrot.lane.b32.xlu0 %v348_v3, %s2275_s8 }
  0x32   : > { %1025 = vrot.lane.b32.xlu1 %v345_v5, %s2275_s8 }
  0x34   : > { %1021 = vrot.lane.b32.xlu0 %v2336_v1, %s2275_s8 }
  0x36   : > { %1027 = vrot.lane.b32.xlu1 %v349_v6, %s2275_s8 }
  0x38   : > { %1196 = vrot.lane.b32.xlu0 %v348_v3, %s2276_s9 }
  0x3a   : > { %1198 = vrot.lane.b32.xlu1 %v345_v5, %s2276_s9 }
  0x3c   : > { %1194 = vrot.lane.b32.xlu0 %v2336_v1, %s2276_s9 }
  0x3e   : > { %1200 = vrot.lane.b32.xlu1 %v349_v6, %s2276_s9 }
  0x40   : > { %1369 = vrot.lane.b32.xlu0 %v348_v3, %s2277_s10 }
  0x42   : > { %1371 = vrot.lane.b32.xlu1 %v345_v5, %s2277_s10 }
  0x44   : > { %1367 = vrot.lane.b32.xlu0 %v2336_v1, %s2277_s10 }
  0x46   : > { %1373 = vrot.lane.b32.xlu1 %v349_v6, %s2277_s10  ;;  %s2053_s10 = sshll.u32 %s2506_s18, 3 }
  0x47   : > { %s2467_s13 = scalar_lea.vmem %s2499_s4, %s2053_s10  ;;  %s325_s22 = scalar_lea.vmem %s2500_s5, %s2053_s10 }
  0x48   : > { %1542 = vrot.lane.b32.xlu0 %v348_v3, %s2278_s11  ;;  %331 = vst.msk [vmem:[%s2467_s13] sm:$0xff] %vm330_vm11, %v2270_v0  ;;  %332 = vst.msk [vmem:[%s325_s22] sm:$0xff] %vm330_vm11, %v2270_v0 }
  0x4a   : > { %1544 = vrot.lane.b32.xlu1 %v345_v5, %s2278_s11 }
  0x4c   : > { %1540 = vrot.lane.b32.xlu0 %v2336_v1, %s2278_s11 }
  0x4e   : > { %1546 = vrot.lane.b32.xlu1 %v349_v6, %s2278_s11 }
  0x50   : > { %1715 = vrot.lane.b32.xlu0 %v348_v3, %s2279_s12 }
  0x52   : > { %1717 = vrot.lane.b32.xlu1 %v345_v5, %s2279_s12  ;;  %v2096_v5 = vld [vmem:[%s2497_s2 + $0x38] sm:$0xff] }
  0x54   : > { %1713 = vrot.lane.b32.xlu0 %v2336_v1, %s2279_s12 }
  0x56   : > { %1719 = vrot.lane.b32.xlu1 %v349_v6, %s2279_s12 }
  0x85   : > { %v351_v8 = vpop.permute.xlu1 %350 }
  0x87   : > { %v353_v7 = vpop.permute.xlu0 %352 }
  0x88   : > { %v359_v13 = vsel %vm358_vm1, %v351_v8, %v353_v7 }
  0x8e   : > { %v355_v9 = vpop.permute.xlu0 %354 }
  0x8f   : > { %v360_v10 = vsel %vm358_vm1, %v353_v7, %v355_v9 }
  0x90   : > { %v357_v12 = vpop.permute.xlu1 %356  ;;  %2056 = vmatprep.subr.msk.mxu0 %vm366_vm2, %v360_v10  ;;  %v1880_v10 = vlaneseq }
  0x91   : > { %v361_v14 = vsel %vm358_vm1, %v355_v9, %v357_v12  ;;  %2057 = vmatpush1.msk.msra.mxu0 %vm366_vm2, %v359_v13  ;;  %v2102_v9 = vld [vmem:[%s2497_s2 + $0x40] sm:$0xff] }
  0x92   : > { %2131 = vmatpush3.msk.msra.mxu1 %vm366_vm2, %v361_v14  ;;  %2058 = vmatmul.mubr.msk.f32.vlgmr.msra.gmra.mrb[0].mxu0 %vm362_vm3, %v2055_v11  ;;  %v678_v15 = vpop.permute.xlu0 %677  ;;  %v1878_v13 = vld [vmem:[%s2498_s3] sm:$0x7] }
  0x93   : > { %2133 = vmatmul.mubr.msk.f32.vlgmr.msra.gmra.mrb[0].mxu1 %vm362_vm3, %v2055_v11  ;;  %2061 = vmatprep.subr.msk.mxu0 %vm366_vm2, %v348_v3  ;;  %v1881_v11 = vshrl.u32 %v1880_v10, 7 }
  0x94   : > { %2062 = vmatpush1.msk.msra.mxu0 %vm366_vm2, %v2336_v1  ;;  %v680_v17 = vpop.permute.xlu1 %679  ;;  %2135 = vmatprep.subr.mxu1 %v2270_v0 }
  0x95   : > { %v685_v18 = vsel %vm683_vm4, %v678_v15, %v680_v17  ;;  %2136 = vmatpush3.msk.msra.mxu1 %vm366_vm2, %v341_v16  ;;  %2137 = vmatprep.mubr.msk.f32.mxu1 %vm2271_vm0, %v2270_v0  ;;  %v1882_v12 = vsub.s32 0, %v1881_v11  ;;  %v1890_v14 = vsub.s32 2, %v1881_v11 }
  0x96   : > { %v676_v19 = vpop.permute.xlu0 %675  ;;  %2067 = vmatprep.subr.msk.mxu0 %vm366_vm2, %v685_v18  ;;  %590 = vmatprep.mubr.f32.mxu0 %v2270_v0 }
  0x97   : > { %2140 = vmatprep.subr.mxu1 %v2270_v0  ;;  %v684_v21 = vsel %vm683_vm4, %v676_v19, %v678_v15  ;;  %v1886_v15 = vsub.s32 1, %v1881_v11  ;;  %v1883_v16 = vrot.slane %v1878_v13, %v1882_v12 }
  0x98   : > { %v682_v22 = vpop.permute.xlu1 %681 }
  0x99   : > { %v686_v23 = vsel %vm683_vm4, %v680_v17, %v682_v22  ;;  %v1891_v17 = vrot.slane %v1878_v13, %v1890_v14  ;;  %v1887_v18 = vrot.slane %v1878_v13, %v1886_v15 }
  0x9a   : > { %v851_v24 = vpop.permute.xlu0 %850  ;;  %2063 = vmatmul.mubr.msk.f32.vlgmr.msra.gmra.mrb[0].mxu0 %vm362_vm3, %v339_v20 }
  0x9b   : > { %2138 = vmatmul.mubr.msk.f32.vlgmr.msra.gmra.mrb[0].mxu1 %vm362_vm3, %v339_v20  ;;  %2068 = vmatpush1.msk.msra.mxu0 %vm366_vm2, %v684_v21 }
  0x9c   : > { %2141 = vmatpush3.msk.msra.mxu1 %vm366_vm2, %v686_v23  ;;  %v853_v25 = vpop.permute.xlu1 %852  ;;  %2142 = vmatprep.mubr.msk.f32.mxu1 %vm2271_vm0, %v2270_v0 }
  0x9d   : > { %v858_v26 = vsel %vm856_vm5, %v851_v24, %v853_v25  ;;  %760 = vmatprep.mubr.f32.mxu0 %v2270_v0  ;;  %2145 = vmatprep.subr.mxu1 %v2270_v0 }
  0x9e   : > { %v849_v27 = vpop.permute.xlu0 %848  ;;  %2073 = vmatprep.subr.msk.mxu0 %vm366_vm2, %v858_v26 }
  0x9f   : > { %v857_v29 = vsel %vm856_vm5, %v849_v27, %v851_v24 }
  0xa0   : > { %v855_v30 = vpop.permute.xlu1 %854 }
  0xa1   : > { %v859_v31 = vsel %vm856_vm5, %v853_v25, %v855_v30 }
  0xa2   : > { %v1024_v32 = vpop.permute.xlu0 %1023  ;;  %2069 = vmatmul.mubr.msk.f32.vlgmr.msra.gmra.mrb[0].mxu0 %vm362_vm3, %v2066_v28 }
  0xa3   : > { %2143 = vmatmul.mubr.msk.f32.vlgmr.msra.gmra.mrb[0].mxu1 %vm362_vm3, %v2066_v28  ;;  %2074 = vmatpush1.msk.msra.mxu0 %vm366_vm2, %v857_v29 }
  0xa4   : > { %2146 = vmatpush3.msk.msra.mxu1 %vm366_vm2, %v859_v31  ;;  %v1026_v33 = vpop.permute.xlu1 %1025  ;;  %2147 = vmatprep.mubr.msk.f32.mxu1 %vm2271_vm0, %v2270_v0 }
  0xa5   : > { %v1031_v34 = vsel %vm1029_vm6, %v1024_v32, %v1026_v33  ;;  %933 = vmatprep.mubr.f32.mxu0 %v2270_v0  ;;  %2150 = vmatprep.subr.mxu1 %v2270_v0 }
  0xa6   : > { %v1022_v35 = vpop.permute.xlu0 %1021  ;;  %2079 = vmatprep.subr.msk.mxu0 %vm366_vm2, %v1031_v34 }
  0xa7   : > { %v1030_v37 = vsel %vm1029_vm6, %v1022_v35, %v1024_v32  ;;  %v1906_v35 = vld [vmem:[%s325_s22] sm:$0xff] }
  0xa8   : > { %v1028_v38 = vpop.permute.xlu1 %1027 }
  0xa9   : > { %v1032_v39 = vsel %vm1029_vm6, %v1026_v33, %v1028_v38  ;;  %v1898_v33 = vld [vmem:[%s2467_s13] sm:$0xff] }
  0xaa   : > { %v1197_v40 = vpop.permute.xlu0 %1196  ;;  %2075 = vmatmul.mubr.msk.f32.vlgmr.msra.gmra.mrb[0].mxu0 %vm362_vm3, %v2072_v36 }
  0xab   : > { %2148 = vmatmul.mubr.msk.f32.vlgmr.msra.gmra.mrb[0].mxu1 %vm362_vm3, %v2072_v36  ;;  %2080 = vmatpush1.msk.msra.mxu0 %vm366_vm2, %v1030_v37 }
  0xac   : > { %2151 = vmatpush3.msk.msra.mxu1 %vm366_vm2, %v1032_v39  ;;  %v1199_v41 = vpop.permute.xlu1 %1198  ;;  %2152 = vmatprep.mubr.msk.f32.mxu1 %vm2271_vm0, %v2270_v0 }
  0xad   : > { %v1204_v42 = vsel %vm1202_vm7, %v1197_v40, %v1199_v41  ;;  %1106 = vmatprep.mubr.f32.mxu0 %v2270_v0  ;;  %2155 = vmatprep.subr.mxu1 %v2270_v0 }
  0xae   : > { %v1195_v43 = vpop.permute.xlu0 %1194  ;;  %2085 = vmatprep.subr.msk.mxu0 %vm366_vm2, %v1204_v42 }
  0xaf   : > { %v1203_v45 = vsel %vm1202_vm7, %v1195_v43, %v1197_v40 }
  0xb0   : > { %v1201_v46 = vpop.permute.xlu1 %1200 }
  0xb1   : > { %v1205_v47 = vsel %vm1202_vm7, %v1199_v41, %v1201_v46 }
  0xb2   : > { %v1370_v48 = vpop.permute.xlu0 %1369  ;;  %2081 = vmatmul.mubr.msk.f32.vlgmr.msra.gmra.mrb[0].mxu0 %vm362_vm3, %v2078_v44 }
  0xb3   : > { %2153 = vmatmul.mubr.msk.f32.vlgmr.msra.gmra.mrb[0].mxu1 %vm362_vm3, %v2078_v44  ;;  %2086 = vmatpush1.msk.msra.mxu0 %vm366_vm2, %v1203_v45 }
  0xb4   : > { %2156 = vmatpush3.msk.msra.mxu1 %vm366_vm2, %v1205_v47  ;;  %v1372_v49 = vpop.permute.xlu1 %1371  ;;  %2157 = vmatprep.mubr.msk.f32.mxu1 %vm2271_vm0, %v2270_v0 }
  0xb5   : > { %v1377_v50 = vsel %vm1375_vm8, %v1370_v48, %v1372_v49  ;;  %1279 = vmatprep.mubr.f32.mxu0 %v2270_v0  ;;  %2160 = vmatprep.subr.mxu1 %v2270_v0 }
  0xb6   : > { %v1368_v51 = vpop.permute.xlu0 %1367  ;;  %2091 = vmatprep.subr.msk.mxu0 %vm366_vm2, %v1377_v50 }
  0xb7   : > { %v1376_v53 = vsel %vm1375_vm8, %v1368_v51, %v1370_v48 }
  0xb8   : > { %v1374_v54 = vpop.permute.xlu1 %1373 }
  0xb9   : > { %v1378_v55 = vsel %vm1375_vm8, %v1372_v49, %v1374_v54 }
  0xba   : > { %v1543_v56 = vpop.permute.xlu0 %1542  ;;  %2087 = vmatmul.mubr.msk.f32.vlgmr.msra.gmra.mrb[0].mxu0 %vm362_vm3, %v2084_v52 }
  0xbb   : > { %2158 = vmatmul.mubr.msk.f32.vlgmr.msra.gmra.mrb[0].mxu1 %vm362_vm3, %v2084_v52  ;;  %2092 = vmatpush1.msk.msra.mxu0 %vm366_vm2, %v1376_v53 }
  0xbc   : > { %2161 = vmatpush3.msk.msra.mxu1 %vm366_vm2, %v1378_v55  ;;  %v1545_v57 = vpop.permute.xlu1 %1544  ;;  %2162 = vmatprep.mubr.msk.f32.mxu1 %vm2271_vm0, %v2270_v0 }
  0xbd   : > { %v1550_v58 = vsel %vm1548_vm9, %v1543_v56, %v1545_v57  ;;  %1452 = vmatprep.mubr.f32.mxu0 %v2270_v0  ;;  %2165 = vmatprep.subr.mxu1 %v2270_v0 }
  0xbe   : > { %v1541_v59 = vpop.permute.xlu0 %1540  ;;  %2097 = vmatprep.subr.msk.mxu0 %vm366_vm2, %v1550_v58 }
  0xbf   : > { %v1549_v61 = vsel %vm1548_vm9, %v1541_v59, %v1543_v56 }
  0xc0   : > { %v1547_v62 = vpop.permute.xlu1 %1546 }
  0xc1   : > { %v1551_v63 = vsel %vm1548_vm9, %v1545_v57, %v1547_v62 }
  0xc2   : > { %v1716_v1 = vpop.permute.xlu0 %1715  ;;  %2093 = vmatmul.mubr.msk.f32.vlgmr.msra.gmra.mrb[0].mxu0 %vm362_vm3, %v2090_v60 }
  0xc3   : > { %2163 = vmatmul.mubr.msk.f32.vlgmr.msra.gmra.mrb[0].mxu1 %vm362_vm3, %v2090_v60  ;;  %2098 = vmatpush1.msk.msra.mxu0 %vm366_vm2, %v1549_v61 }
  0xc4   : > { %2166 = vmatpush3.msk.msra.mxu1 %vm366_vm2, %v1551_v63  ;;  %v1718_v2 = vpop.permute.xlu1 %1717  ;;  %2167 = vmatprep.mubr.msk.f32.mxu1 %vm2271_vm0, %v2270_v0 }
  0xc5   : > { %v1723_v3 = vsel %vm1721_vm10, %v1716_v1, %v1718_v2  ;;  %1625 = vmatprep.mubr.f32.mxu0 %v2270_v0  ;;  %2170 = vmatprep.subr.mxu1 %v2270_v0 }
  0xc6   : > { %v1714_v4 = vpop.permute.xlu0 %1713  ;;  %2103 = vmatprep.subr.msk.mxu0 %vm366_vm2, %v1723_v3 }
  0xc7   : > { %v1722_v6 = vsel %vm1721_vm10, %v1714_v4, %v1716_v1 }
  0xc8   : > { %v1720_v7 = vpop.permute.xlu1 %1719 }
  0xc9   : > { %v1724_v8 = vsel %vm1721_vm10, %v1718_v2, %v1720_v7 }
  0xca   : > { %2099 = vmatmul.mubr.msk.f32.vlgmr.msra.gmra.mrb[0].mxu0 %vm362_vm3, %v2096_v5 }
  0xcb   : > { %2168 = vmatmul.mubr.msk.f32.vlgmr.msra.gmra.mrb[0].mxu1 %vm362_vm3, %v2096_v5  ;;  %2104 = vmatpush1.msk.msra.mxu0 %vm366_vm2, %v1722_v6 }
  0xcc   : > { %2171 = vmatpush3.msk.msra.mxu1 %vm366_vm2, %v1724_v8  ;;  %2172 = vmatprep.mubr.msk.f32.mxu1 %vm2271_vm0, %v2270_v0 }
  0xcd   : > { %1798 = vmatprep.mubr.f32.mxu0 %v2270_v0 }
  0xd2   : > { %2105 = vmatmul.mubr.msk.f32.vlgmr.msra.gmra.mrb[0].mxu0 %vm362_vm3, %v2102_v9 }
  0xd3   : > { %2173 = vmatmul.mubr.msk.f32.vlgmr.msra.gmra.mrb[0].mxu1 %vm362_vm3, %v2102_v9 }
 0x1a5   : > { %v1800_v19 = vpop.f32.mrb[0].mxu0 }
 0x1a6   : > { %v1871_v20 = vpop.f32.mrb[0].mxu1  ;;  %v1895_v21 = vmul.f32 %v1883_v16, %v1800_v19  ;;  %v1802_v22 = vpop.f32.mrb[1].mxu0 }
 0x1a7   : > { %v1897_v23 = vmul.f32 %v1891_v17, %v1871_v20  ;;  %v2174_v24 = vpop.f32.mrb[1].mxu1  ;;  %v1896_v25 = vmul.f32 %v1887_v18, %v1802_v22 }
 0x1a8   : > { %v1907_v26 = vmul.f32 %v1895_v21, %v1800_v19 }
 0x1a9   : > { %v1899_v27 = vadd.f32 %v1896_v25, %v1895_v21  ;;  %v1908_v28 = vmul.f32 %v1896_v25, %v1802_v22  ;;  %v1909_v29 = vmul.f32 %v1897_v23, %v1871_v20 }
 0x1ab   : > { %v1910_v30 = vadd.f32 %v1908_v28, %v1907_v26  ;;  %v1900_v31 = vadd.f32 %v1899_v27, %v1897_v23 }
 0x1ad   : > { %1901 = vadd.xlane.f32.xlu0 %v1900_v31  ;;  %v1911_v32 = vadd.f32 %v1910_v30, %v1909_v29 }
 0x1af   : > { %1912 = vadd.xlane.f32.xlu1 %v1911_v32 }
 0x23a   : > { %v1902_v34 = vpop.xlane.xlu0 %1901 }
 0x23b   : > { %v1903_v36 = vadd.f32 %v1902_v34, %v1898_v33 }
 0x23c   : > { %v1913_v37 = vpop.xlane.xlu1 %1912 }
 0x23d   : > { %1905 = vst.msk [vmem:[%s2467_s13] sm:$0xff] %vm330_vm11, %v1903_v36  ;;  %v1914_v38 = vadd.f32 %v1913_v37, %v1906_v35 }
 0x23f   : > { %1915 = vst.msk [vmem:[%s325_s22] sm:$0xff] %vm330_vm11, %v1914_v38 }
 0x240 PF: > { %s16_s20 = sadd.s32 1, %s2268_s20   ;;  %s2501_s18 = smov %s2264_s19 }
 0x241   : > { %p13_p5 = scmp.ge.s32.totalorder %s16_s20, 4   ;;  %s2502_s19 = smov %s2504_s21 }
 0x243   :  { %15 = sbr.rel (!%p13_p5) target bundleno = 2 (0x2), region = 96 }

</bundles_post_ra>
